<compile_context>
chip_gen: v7x
topology: tpu7x:2x2x1
jax: 0.10.0
libtpu: 0.0.40
codegen_flags: <defaults>
</compile_context>

<pallas_src>
import functools
import math

import jax
import jax.numpy as jnp
from jax.experimental import pallas as pl
from jax.experimental.pallas import tpu as pltpu

LN_EPS = 1e-5       # PyTorch nn.LayerNorm default
NEG_INF = -1e9      # finite additive-mask value (avoids NaN for fully-masked rows)


# ---------------- shared math (traced inside the Pallas kernel and in the reference) ----------------

def _layernorm(x, g, b):
    mu = jnp.mean(x, axis=-1, keepdims=True)
    var = jnp.mean((x - mu) ** 2, axis=-1, keepdims=True)
    return (x - mu) * jax.lax.rsqrt(var + LN_EPS) * g + b


def _mm(a, w, bias):
    """bf16 MXU matmul with f32 accumulation: (M,K) f32 x (K,N) bf16 + (1,N) f32."""
    return jnp.dot(a.astype(jnp.bfloat16), w, preferred_element_type=jnp.float32) + bias


def _attention(q, k, v, add_mask, nheads, bsz, tq, sk, recip):
    """fairseq MultiheadAttention core (no dropout), batched over the block's batch dim.

    q: (bsz*tq, E) f32, k/v: (bsz*sk, E) f32.
    add_mask: additive f32 mask broadcastable to (bsz, tq, sk).
    """
    E = q.shape[-1]
    D = E // nheads
    q = (q * (D ** -0.5)).reshape(bsz, tq, E)    # fairseq scales q after in-proj + bias
    k = k.reshape(bsz, sk, E)
    v = v.reshape(bsz, sk, E)
    ctx = []
    # TODO(synk): replace the per-head lane-slice loop with one layout-aware relayout + a
    #             single (b,h)-batched einsum at production head dims.
    for h in range(nheads):
        qh = q[:, :, h * D:(h + 1) * D].astype(jnp.bfloat16)
        kh = k[:, :, h * D:(h + 1) * D].astype(jnp.bfloat16)
        vh = v[:, :, h * D:(h + 1) * D].astype(jnp.bfloat16)
        s = jnp.einsum("btd,bsd->bts", qh, kh, preferred_element_type=jnp.float32)
        s = s + add_mask                                   # causal (tq,tq) or padding (bsz,1,sk)
        m = jnp.max(s, axis=-1, keepdims=True)
        e = jnp.exp(s - m)                                 # f32 softmax math
        p = e * recip(jnp.sum(e, axis=-1, keepdims=True))  # EUP reciprocal inside the kernel
        ctx.append(jnp.einsum("bts,bsd->btd", p.astype(jnp.bfloat16), vh,
                              preferred_element_type=jnp.float32))
    return jnp.concatenate(ctx, axis=-1).reshape(bsz * tq, E)


def _forward_block(x, enc, causal, pad_add, ln, w, bp, nheads, bsz, tq, sk, recip):
    """One batch block, flattened over (bsz*tq) rows.

    x: (bsz*tq, E), enc: (bsz*sk, E). `ln`/`w`/`bp` may be VMEM Refs (sliced lazily next to
    each matmul) or plain arrays (pure-JAX reference path).
    """
    E = x.shape[-1]
    g0, be0 = ln[0:1, :], ln[1:2, :]
    g1, be1 = ln[2:3, :], ln[3:4, :]
    g2, be2 = ln[4:5, :], ln[5:6, :]

    # --- self attention block (pre-norm), mask_future_timesteps=True ---
    res = x
    h = _layernorm(x, g0, be0)
    qkv = _mm(h, w[:, 0:3 * E], bp[:, 0:3 * E])              # one fused qkv projection, M=bsz*tq
    h = _attention(qkv[:, 0:E], qkv[:, E:2 * E], qkv[:, 2 * E:3 * E],
                   causal, nheads, bsz, tq, tq, recip)
    x = res + _mm(h, w[:, 3 * E:4 * E], bp[:, 3 * E:4 * E])  # out-proj

    # --- encoder attention block (pre-norm), key_padding_mask, static_kv ---
    res = x
    h = _layernorm(x, g1, be1)
    q = _mm(h, w[:, 4 * E:5 * E], bp[:, 4 * E:5 * E])        # query projection
    kv = _mm(enc, w[:, 5 * E:7 * E], bp[:, 5 * E:7 * E])     # K/V computed ONCE per block (static_kv)
    h = _attention(q, kv[:, 0:E], kv[:, E:2 * E], pad_add, nheads, bsz, tq, sk, recip)
    x = res + _mm(h, w[:, 7 * E:8 * E], bp[:, 7 * E:8 * E])  # out-proj

    # --- feed forward block (pre-norm): fc1 -> relu -> fc2 ---
    res = x
    h = _layernorm(x, g2, be2)
    h = jnp.maximum(_mm(h, w[:, 8 * E:9 * E], bp[:, 8 * E:9 * E]), 0.0)
    h = _mm(h, w[:, 9 * E:10 * E], bp[:, 9 * E:10 * E])
    return res + h


# ---------------- Pallas kernel ----------------

def _decoder_layer_kernel(x_ref, enc_ref, causal_ref, pad_ref, ln_ref, w_ref, b_ref,
                          out_ref, *, nheads, b_blk, T, S, E):
    x = x_ref[...].reshape(b_blk * T, E)        # flatten batch block into the matmul M dim
    enc = enc_ref[...].reshape(b_blk * S, E)
    recip = lambda t: pl.reciprocal(t, approx=True)   # single EUP vrcp
    y = _forward_block(x, enc, causal_ref[...], pad_ref[...],
                       ln_ref, w_ref, b_ref, nheads, b_blk, T, S, recip)
    out_ref[...] = y.reshape(b_blk, T, E)


# ---------------- host-side packing + wrapper ----------------

def _pack_params(params, E):
    (ln0g, ln0b, ln1g, ln1b, ln2g, ln2b,
     sa_w, sa_b, sa_ow, sa_ob,
     ea_w, ea_b, ea_ow, ea_ob,
     f1w, f1b, f2w, f2b) = params
    ln_pack = jnp.concatenate([ln0g, ln0b, ln1g, ln1b, ln2g, ln2b], axis=0)      # (6, E) f32
    # pre-transpose every weight to (in, out), pack into one slab, store as bf16 (MXU rate;
    # halves weight VMEM/HBM bytes).
    w_pack = jnp.concatenate([sa_w.T, sa_ow.T, ea_w.T, ea_ow.T, f1w.T, f2w.T],
                             axis=1).astype(jnp.bfloat16)                        # (E, 10E) bf16
    b_pack = jnp.concatenate([sa_b, sa_ob, ea_b, ea_ob, f1b, f2b],
                             axis=1).astype(jnp.float32)                         # (1, 10E) f32
    return ln_pack.astype(jnp.float32), w_pack, b_pack


def transformer_decoder_layer(x_tbe, enc_sbe, enc_padding_mask, params, nheads, b_blk=None):
    """x_tbe:(T,B,E), enc_sbe:(S,B,E), enc_padding_mask:(B,S) bool -> (T,B,E)."""
    T, B, E = x_tbe.shape
    S = enc_sbe.shape[0]
    if b_blk is None:
        # >=2 grid steps whenever possible: both v7x TensorCores get work, and on 1-TC chips
        # the x/enc DMA and output writeback overlap compute across steps.
        b_blk = B // 2 if (B % 2 == 0 and B >= 2) else B
    assert B % b_blk == 0, "batch must be divisible by the per-step batch block"

    # batch-major activations give contiguous per-batch blocks.
    # TODO(synk): at production sizes feed the native (T,B,E)/(S,B,E) layout via strided
    #             index_maps instead of these host transposes.
    x = jnp.transpose(x_tbe, (1, 0, 2)).astype(jnp.float32)        # (B, T, E)
    enc = jnp.transpose(enc_sbe, (1, 0, 2)).astype(jnp.float32)    # (B, S, E)
    pad_add = jnp.where(enc_padding_mask, NEG_INF, 0.0).astype(jnp.float32)[:, None, :]  # (B,1,S)

    # causal additive mask hoisted out of the kernel body (built once, not per grid step)
    row = jax.lax.broadcasted_iota(jnp.int32, (T, T), 0)
    col = jax.lax.broadcasted_iota(jnp.int32, (T, T), 1)
    causal = jnp.where(col > row, NEG_INF, 0.0).astype(jnp.float32)

    ln_pack, w_pack, b_pack = _pack_params(params, E)

    kernel = functools.partial(_decoder_layer_kernel, nheads=nheads, b_blk=b_blk, T=T, S=S, E=E)
    out = pl.pallas_call(
        kernel,
        out_shape=jax.ShapeDtypeStruct((B, T, E), jnp.float32),
        grid=(B // b_blk,),
        in_specs=[
            pl.BlockSpec((b_blk, T, E), lambda g: (g, 0, 0)),   # x
            pl.BlockSpec((b_blk, S, E), lambda g: (g, 0, 0)),   # encoder_out
            pl.BlockSpec((T, T), lambda g: (0, 0)),             # causal additive mask (constant)
            pl.BlockSpec((b_blk, 1, S), lambda g: (g, 0, 0)),   # key-padding additive mask
            pl.BlockSpec((6, E), lambda g: (0, 0)),             # packed LayerNorm params (constant)
            pl.BlockSpec((E, 10 * E), lambda g: (0, 0)),        # packed bf16 (in,out) weights (constant)
            pl.BlockSpec((1, 10 * E), lambda g: (0, 0)),        # packed biases (constant)
        ],
        out_specs=pl.BlockSpec((b_blk, T, E), lambda g: (g, 0, 0)),
        compiler_params=pltpu.CompilerParams(
            dimension_semantics=("parallel",),
            vmem_limit_bytes=64 * 1024 * 1024,   # explicit VMEM budget; re-derive per generation
        ),
    )(x, enc, causal, pad_add, ln_pack, w_pack, b_pack)
    return jnp.transpose(out, (1, 0, 2))


# ---------------- deterministic parameter init (matches module __init__) ----------------

def init_params(key, E):
    ks = jax.random.split(key, 6)

    def xavier(k, out_f, in_f):
        bound = math.sqrt(6.0 / (in_f + out_f))
        return jax.random.uniform(k, (out_f, in_f), jnp.float32, -bound, bound)

    ones = jnp.ones((1, E), jnp.float32)
    zeros = jnp.zeros((1, E), jnp.float32)
    return (
        ones, zeros,                                                  # LayerNorm 0
        ones, zeros,                                                  # LayerNorm 1
        ones, zeros,                                                  # LayerNorm 2 (index -1)
        xavier(ks[0], 3 * E, E), jnp.zeros((1, 3 * E), jnp.float32),  # self-attn in_proj
        xavier(ks[1], E, E), jnp.zeros((1, E), jnp.float32),          # self-attn out_proj
        xavier(ks[2], 3 * E, E), jnp.zeros((1, 3 * E), jnp.float32),  # enc-attn in_proj
        xavier(ks[3], E, E), jnp.zeros((1, E), jnp.float32),          # enc-attn out_proj
        xavier(ks[4], E, E), jnp.zeros((1, E), jnp.float32),          # fc1
        xavier(ks[5], E, E), jnp.zeros((1, E), jnp.float32),          # fc2
    )


if __name__ == "__main__":
    E, H = 32, 4          # embed_dim, n_att
    T, S, B = 8, 16, 2    # target len, source len, batch

    key = jax.random.PRNGKey(0)
    kx, ke, kparam = jax.random.split(key, 3)
    x = jax.random.normal(kx, (T, B, E), jnp.float32)            # (T, B, E)
    enc = jax.random.normal(ke, (S, B, E), jnp.float32)          # (S, B, E)
    pad = jnp.zeros((B, S), dtype=bool).at[1, S - 3:].set(True)  # (B, S) key padding mask
    params = init_params(kparam, E)

    out = transformer_decoder_layer(x, enc, pad, params, H)
    out = jax.block_until_ready(out)

    # pure-JAX reference sharing the exact same bf16-operand / f32-accumulate math; the only
    # difference is the softmax reciprocal (kernel: approx EUP vrcp; reference: exact divide).
    xb = jnp.transpose(x, (1, 0, 2)).astype(jnp.float32).reshape(B * T, E)
    eb = jnp.transpose(enc, (1, 0, 2)).astype(jnp.float32).reshape(B * S, E)
    pad_add = jnp.where(pad, NEG_INF, 0.0).astype(jnp.float32)[:, None, :]
    row = jax.lax.broadcasted_iota(jnp.int32, (T, T), 0)
    col = jax.lax.broadcasted_iota(jnp.int32, (T, T), 1)
    causal = jnp.where(col > row, NEG_INF, 0.0).astype(jnp.float32)
    ln_pack, w_pack, b_pack = _pack_params(params, E)
    ref = _forward_block(xb, eb, causal, pad_add, ln_pack, w_pack, b_pack, H, B, T, S,
                         lambda t: 1.0 / t)
    ref = jnp.transpose(ref.reshape(B, T, E), (1, 0, 2))

    assert out.shape == (T, B, E)
    max_err = float(jnp.max(jnp.abs(out - ref)))
    assert jnp.allclose(out, ref, atol=2e-2, rtol=2e-2), max_err
    print("KERNEL_OK")
</pallas_src>

<mosaic_0001>
module attributes {stable_mosaic.version = 11 : i64} {
  func.func @_decoder_layer_kernel(%arg0: i32, %arg1: memref<1x8x32xf32, #tpu.memory_space<vmem>>, %arg2: memref<1x16x32xf32, #tpu.memory_space<vmem>>, %arg3: memref<8x8xf32, #tpu.memory_space<vmem>>, %arg4: memref<1x1x16xf32, #tpu.memory_space<vmem>>, %arg5: memref<6x32xf32, #tpu.memory_space<vmem>>, %arg6: memref<32x320xbf16, #tpu.memory_space<vmem>>, %arg7: memref<1x320xf32, #tpu.memory_space<vmem>>, %arg8: memref<1x8x32xf32, #tpu.memory_space<vmem>>) attributes {dimension_semantics = [#tpu.dimension_semantics<parallel>], iteration_bounds = array<i64: 2>, scalar_prefetch = 0 : i64, scratch_operands = 0 : i64, tpu.core_type = #tpu.core_type<tc>, window_params = [{transform_indices = @transform_0, window_bounds = array<i64: 1, 8, 32>}, {transform_indices = @transform_1, window_bounds = array<i64: 1, 16, 32>}, {pipeline_mode = #tpu.pipeline_mode<synchronous>, transform_indices = @transform_2, window_bounds = array<i64: 8, 8>}, {transform_indices = @transform_3, window_bounds = array<i64: 1, 1, 16>}, {pipeline_mode = #tpu.pipeline_mode<synchronous>, transform_indices = @transform_4, window_bounds = array<i64: 6, 32>}, {pipeline_mode = #tpu.pipeline_mode<synchronous>, transform_indices = @transform_5, window_bounds = array<i64: 32, 320>}, {pipeline_mode = #tpu.pipeline_mode<synchronous>, transform_indices = @transform_6, window_bounds = array<i64: 1, 320>}, {transform_indices = @transform_7, window_bounds = array<i64: 1, 8, 32>}]} {
    %c0 = arith.constant 0 : index
    %c0_0 = arith.constant 0 : index
    %c0_1 = arith.constant 0 : index
    %0 = vector.load %arg1[%c0, %c0_0, %c0_1] : memref<1x8x32xf32, #tpu.memory_space<vmem>>, vector<1x8x32xf32>
    %1 = vector.shape_cast %0 : vector<1x8x32xf32> to vector<8x32xf32>
    %c0_2 = arith.constant 0 : index
    %c0_3 = arith.constant 0 : index
    %c0_4 = arith.constant 0 : index
    %2 = vector.load %arg2[%c0_2, %c0_3, %c0_4] : memref<1x16x32xf32, #tpu.memory_space<vmem>>, vector<1x16x32xf32>
    %3 = vector.shape_cast %2 : vector<1x16x32xf32> to vector<16x32xf32>
    %c0_5 = arith.constant 0 : index
    %c0_6 = arith.constant 0 : index
    %4 = vector.load %arg3[%c0_5, %c0_6] : memref<8x8xf32, #tpu.memory_space<vmem>>, vector<8x8xf32>
    %c0_7 = arith.constant 0 : index
    %c0_8 = arith.constant 0 : index
    %c0_9 = arith.constant 0 : index
    %5 = vector.load %arg4[%c0_7, %c0_8, %c0_9] : memref<1x1x16xf32, #tpu.memory_space<vmem>>, vector<1x1x16xf32>
    %c0_10 = arith.constant 0 : index
    %c0_11 = arith.constant 0 : index
    %6 = vector.load %arg5[%c0_10, %c0_11] : memref<6x32xf32, #tpu.memory_space<vmem>>, vector<1x32xf32>
    %c1 = arith.constant 1 : index
    %c0_12 = arith.constant 0 : index
    %7 = vector.load %arg5[%c1, %c0_12] : memref<6x32xf32, #tpu.memory_space<vmem>>, vector<1x32xf32>
    %c2 = arith.constant 2 : index
    %c0_13 = arith.constant 0 : index
    %8 = vector.load %arg5[%c2, %c0_13] : memref<6x32xf32, #tpu.memory_space<vmem>>, vector<1x32xf32>
    %c3 = arith.constant 3 : index
    %c0_14 = arith.constant 0 : index
    %9 = vector.load %arg5[%c3, %c0_14] : memref<6x32xf32, #tpu.memory_space<vmem>>, vector<1x32xf32>
    %c4 = arith.constant 4 : index
    %c0_15 = arith.constant 0 : index
    %10 = vector.load %arg5[%c4, %c0_15] : memref<6x32xf32, #tpu.memory_space<vmem>>, vector<1x32xf32>
    %c5 = arith.constant 5 : index
    %c0_16 = arith.constant 0 : index
    %11 = vector.load %arg5[%c5, %c0_16] : memref<6x32xf32, #tpu.memory_space<vmem>>, vector<1x32xf32>
    %cst = arith.constant dense<0.000000e+00> : vector<8xf32>
    %12 = vector.multi_reduction <add>, %1, %cst [1] : vector<8x32xf32> to vector<8xf32>
    %13 = vector.shape_cast %12 : vector<8xf32> to vector<8x1xf32>
    %cst_17 = arith.constant 3.200000e+01 : f32
    %14 = vector.broadcast %cst_17 : f32 to vector<8x1xf32>
    %15 = arith.divf %13, %14 : vector<8x1xf32>
    %16 = vector.broadcast %15 : vector<8x1xf32> to vector<8x32xf32>
    %17 = arith.subf %1, %16 : vector<8x32xf32>
    %18 = arith.mulf %17, %17 : vector<8x32xf32>
    %cst_18 = arith.constant dense<0.000000e+00> : vector<8xf32>
    %19 = vector.multi_reduction <add>, %18, %cst_18 [1] : vector<8x32xf32> to vector<8xf32>
    %20 = vector.shape_cast %19 : vector<8xf32> to vector<8x1xf32>
    %cst_19 = arith.constant 3.200000e+01 : f32
    %21 = vector.broadcast %cst_19 : f32 to vector<8x1xf32>
    %22 = arith.divf %20, %21 : vector<8x1xf32>
    %23 = vector.broadcast %15 : vector<8x1xf32> to vector<8x32xf32>
    %24 = arith.subf %1, %23 : vector<8x32xf32>
    %cst_20 = arith.constant 9.99999974E-6 : f32
    %25 = vector.broadcast %cst_20 : f32 to vector<8x1xf32>
    %26 = arith.addf %22, %25 : vector<8x1xf32>
    %27 = math.rsqrt %26 : vector<8x1xf32>
    %28 = vector.broadcast %27 : vector<8x1xf32> to vector<8x32xf32>
    %29 = arith.mulf %24, %28 : vector<8x32xf32>
    %30 = vector.broadcast %6 : vector<1x32xf32> to vector<8x32xf32>
    %31 = arith.mulf %29, %30 : vector<8x32xf32>
    %32 = vector.broadcast %7 : vector<1x32xf32> to vector<8x32xf32>
    %33 = arith.addf %31, %32 : vector<8x32xf32>
    %c0_21 = arith.constant 0 : index
    %c0_22 = arith.constant 0 : index
    %34 = vector.load %arg6[%c0_21, %c0_22] : memref<32x320xbf16, #tpu.memory_space<vmem>>, vector<32x96xbf16>
    %c0_23 = arith.constant 0 : index
    %c0_24 = arith.constant 0 : index
    %35 = vector.load %arg7[%c0_23, %c0_24] : memref<1x320xf32, #tpu.memory_space<vmem>>, vector<1x96xf32>
    %36 = arith.truncf %33 : vector<8x32xf32> to vector<8x32xbf16>
    %cst_25 = arith.constant dense<0.000000e+00> : vector<8x96xf32>
    %37 = tpu.matmul %36, %34, %cst_25 {dimension_numbers = #tpu.dot_dimension_numbers<[1], [0], [0], [1], [0, 0, 1, 1], [], []>} : vector<8x32xbf16>, vector<32x96xbf16>, vector<8x96xf32> -> vector<8x96xf32>
    %38 = vector.broadcast %35 : vector<1x96xf32> to vector<8x96xf32>
    %39 = arith.addf %37, %38 : vector<8x96xf32>
    %40 = vector.extract_strided_slice %39 {offsets = [0, 0], sizes = [8, 32], strides = [1, 1]} : vector<8x96xf32> to vector<8x32xf32>
    %41 = vector.extract_strided_slice %39 {offsets = [0, 32], sizes = [8, 32], strides = [1, 1]} : vector<8x96xf32> to vector<8x32xf32>
    %42 = vector.extract_strided_slice %39 {offsets = [0, 64], sizes = [8, 32], strides = [1, 1]} : vector<8x96xf32> to vector<8x32xf32>
    %cst_26 = arith.constant 0.353553385 : f32
    %43 = vector.broadcast %cst_26 : f32 to vector<8x32xf32>
    %44 = arith.mulf %40, %43 : vector<8x32xf32>
    %45 = vector.shape_cast %44 : vector<8x32xf32> to vector<1x8x32xf32>
    %46 = vector.shape_cast %41 : vector<8x32xf32> to vector<1x8x32xf32>
    %47 = vector.shape_cast %42 : vector<8x32xf32> to vector<1x8x32xf32>
    %48 = vector.extract_strided_slice %45 {offsets = [0, 0, 0], sizes = [1, 8, 8], strides = [1, 1, 1]} : vector<1x8x32xf32> to vector<1x8x8xf32>
    %49 = arith.truncf %48 : vector<1x8x8xf32> to vector<1x8x8xbf16>
    %50 = vector.extract_strided_slice %46 {offsets = [0, 0, 0], sizes = [1, 8, 8], strides = [1, 1, 1]} : vector<1x8x32xf32> to vector<1x8x8xf32>
    %51 = arith.truncf %50 : vector<1x8x8xf32> to vector<1x8x8xbf16>
    %52 = vector.extract_strided_slice %47 {offsets = [0, 0, 0], sizes = [1, 8, 8], strides = [1, 1, 1]} : vector<1x8x32xf32> to vector<1x8x8xf32>
    %53 = arith.truncf %52 : vector<1x8x8xf32> to vector<1x8x8xbf16>
    "tpu.trace_start"() <{level = 10 : i32, message = "btd,bsd->bts"}> : () -> ()
    %cst_27 = arith.constant dense<0.000000e+00> : vector<1x8x8xf32>
    %54 = tpu.matmul %49, %51, %cst_27 {dimension_numbers = #tpu.dot_dimension_numbers<[2], [2], [1], [1], [0, 0, 0, 1, 1, 1], [0], [0]>} : vector<1x8x8xbf16>, vector<1x8x8xbf16>, vector<1x8x8xf32> -> vector<1x8x8xf32>
    "tpu.trace_stop"() : () -> ()
    %55 = vector.shape_cast %4 : vector<8x8xf32> to vector<1x8x8xf32>
    %56 = arith.addf %54, %55 : vector<1x8x8xf32>
    %cst_28 = arith.constant dense<0xFF800000> : vector<1x8xf32>
    %57 = vector.multi_reduction <maximumf>, %56, %cst_28 [2] : vector<1x8x8xf32> to vector<1x8xf32>
    %58 = vector.shape_cast %57 : vector<1x8xf32> to vector<1x8x1xf32>
    %59 = vector.broadcast %58 : vector<1x8x1xf32> to vector<1x8x8xf32>
    %60 = arith.subf %56, %59 : vector<1x8x8xf32>
    %61 = math.exp %60 : vector<1x8x8xf32>
    %cst_29 = arith.constant dense<0.000000e+00> : vector<1x8xf32>
    %62 = vector.multi_reduction <add>, %61, %cst_29 [2] : vector<1x8x8xf32> to vector<1x8xf32>
    %63 = vector.shape_cast %62 : vector<1x8xf32> to vector<1x8x1xf32>
    %64 = tpu.reciprocal %63 {approx = true} : vector<1x8x1xf32> -> vector<1x8x1xf32>
    %65 = vector.broadcast %64 : vector<1x8x1xf32> to vector<1x8x8xf32>
    %66 = arith.mulf %61, %65 : vector<1x8x8xf32>
    %67 = arith.truncf %66 : vector<1x8x8xf32> to vector<1x8x8xbf16>
    "tpu.trace_start"() <{level = 10 : i32, message = "bts,bsd->btd"}> : () -> ()
    %cst_30 = arith.constant dense<0.000000e+00> : vector<1x8x8xf32>
    %68 = tpu.matmul %67, %53, %cst_30 {dimension_numbers = #tpu.dot_dimension_numbers<[2], [1], [1], [2], [0, 0, 0, 1, 1, 2], [0], [0]>} : vector<1x8x8xbf16>, vector<1x8x8xbf16>, vector<1x8x8xf32> -> vector<1x8x8xf32>
    "tpu.trace_stop"() : () -> ()
    %69 = vector.extract_strided_slice %45 {offsets = [0, 0, 8], sizes = [1, 8, 8], strides = [1, 1, 1]} : vector<1x8x32xf32> to vector<1x8x8xf32>
    %70 = arith.truncf %69 : vector<1x8x8xf32> to vector<1x8x8xbf16>
    %71 = vector.extract_strided_slice %46 {offsets = [0, 0, 8], sizes = [1, 8, 8], strides = [1, 1, 1]} : vector<1x8x32xf32> to vector<1x8x8xf32>
    %72 = arith.truncf %71 : vector<1x8x8xf32> to vector<1x8x8xbf16>
    %73 = vector.extract_strided_slice %47 {offsets = [0, 0, 8], sizes = [1, 8, 8], strides = [1, 1, 1]} : vector<1x8x32xf32> to vector<1x8x8xf32>
    %74 = arith.truncf %73 : vector<1x8x8xf32> to vector<1x8x8xbf16>
    "tpu.trace_start"() <{level = 10 : i32, message = "btd,bsd->bts"}> : () -> ()
    %cst_31 = arith.constant dense<0.000000e+00> : vector<1x8x8xf32>
    %75 = tpu.matmul %70, %72, %cst_31 {dimension_numbers = #tpu.dot_dimension_numbers<[2], [2], [1], [1], [0, 0, 0, 1, 1, 1], [0], [0]>} : vector<1x8x8xbf16>, vector<1x8x8xbf16>, vector<1x8x8xf32> -> vector<1x8x8xf32>
    "tpu.trace_stop"() : () -> ()
    %76 = vector.shape_cast %4 : vector<8x8xf32> to vector<1x8x8xf32>
    %77 = arith.addf %75, %76 : vector<1x8x8xf32>
    %cst_32 = arith.constant dense<0xFF800000> : vector<1x8xf32>
    %78 = vector.multi_reduction <maximumf>, %77, %cst_32 [2] : vector<1x8x8xf32> to vector<1x8xf32>
    %79 = vector.shape_cast %78 : vector<1x8xf32> to vector<1x8x1xf32>
    %80 = vector.broadcast %79 : vector<1x8x1xf32> to vector<1x8x8xf32>
    %81 = arith.subf %77, %80 : vector<1x8x8xf32>
    %82 = math.exp %81 : vector<1x8x8xf32>
    %cst_33 = arith.constant dense<0.000000e+00> : vector<1x8xf32>
    %83 = vector.multi_reduction <add>, %82, %cst_33 [2] : vector<1x8x8xf32> to vector<1x8xf32>
    %84 = vector.shape_cast %83 : vector<1x8xf32> to vector<1x8x1xf32>
    %85 = tpu.reciprocal %84 {approx = true} : vector<1x8x1xf32> -> vector<1x8x1xf32>
    %86 = vector.broadcast %85 : vector<1x8x1xf32> to vector<1x8x8xf32>
    %87 = arith.mulf %82, %86 : vector<1x8x8xf32>
    %88 = arith.truncf %87 : vector<1x8x8xf32> to vector<1x8x8xbf16>
    "tpu.trace_start"() <{level = 10 : i32, message = "bts,bsd->btd"}> : () -> ()
    %cst_34 = arith.constant dense<0.000000e+00> : vector<1x8x8xf32>
    %89 = tpu.matmul %88, %74, %cst_34 {dimension_numbers = #tpu.dot_dimension_numbers<[2], [1], [1], [2], [0, 0, 0, 1, 1, 2], [0], [0]>} : vector<1x8x8xbf16>, vector<1x8x8xbf16>, vector<1x8x8xf32> -> vector<1x8x8xf32>
    "tpu.trace_stop"() : () -> ()
    %90 = vector.extract_strided_slice %45 {offsets = [0, 0, 16], sizes = [1, 8, 8], strides = [1, 1, 1]} : vector<1x8x32xf32> to vector<1x8x8xf32>
    %91 = arith.truncf %90 : vector<1x8x8xf32> to vector<1x8x8xbf16>
    %92 = vector.extract_strided_slice %46 {offsets = [0, 0, 16], sizes = [1, 8, 8], strides = [1, 1, 1]} : vector<1x8x32xf32> to vector<1x8x8xf32>
    %93 = arith.truncf %92 : vector<1x8x8xf32> to vector<1x8x8xbf16>
    %94 = vector.extract_strided_slice %47 {offsets = [0, 0, 16], sizes = [1, 8, 8], strides = [1, 1, 1]} : vector<1x8x32xf32> to vector<1x8x8xf32>
    %95 = arith.truncf %94 : vector<1x8x8xf32> to vector<1x8x8xbf16>
    "tpu.trace_start"() <{level = 10 : i32, message = "btd,bsd->bts"}> : () -> ()
    %cst_35 = arith.constant dense<0.000000e+00> : vector<1x8x8xf32>
    %96 = tpu.matmul %91, %93, %cst_35 {dimension_numbers = #tpu.dot_dimension_numbers<[2], [2], [1], [1], [0, 0, 0, 1, 1, 1], [0], [0]>} : vector<1x8x8xbf16>, vector<1x8x8xbf16>, vector<1x8x8xf32> -> vector<1x8x8xf32>
    "tpu.trace_stop"() : () -> ()
    %97 = vector.shape_cast %4 : vector<8x8xf32> to vector<1x8x8xf32>
    %98 = arith.addf %96, %97 : vector<1x8x8xf32>
    %cst_36 = arith.constant dense<0xFF800000> : vector<1x8xf32>
    %99 = vector.multi_reduction <maximumf>, %98, %cst_36 [2] : vector<1x8x8xf32> to vector<1x8xf32>
    %100 = vector.shape_cast %99 : vector<1x8xf32> to vector<1x8x1xf32>
    %101 = vector.broadcast %100 : vector<1x8x1xf32> to vector<1x8x8xf32>
    %102 = arith.subf %98, %101 : vector<1x8x8xf32>
    %103 = math.exp %102 : vector<1x8x8xf32>
    %cst_37 = arith.constant dense<0.000000e+00> : vector<1x8xf32>
    %104 = vector.multi_reduction <add>, %103, %cst_37 [2] : vector<1x8x8xf32> to vector<1x8xf32>
    %105 = vector.shape_cast %104 : vector<1x8xf32> to vector<1x8x1xf32>
    %106 = tpu.reciprocal %105 {approx = true} : vector<1x8x1xf32> -> vector<1x8x1xf32>
    %107 = vector.broadcast %106 : vector<1x8x1xf32> to vector<1x8x8xf32>
    %108 = arith.mulf %103, %107 : vector<1x8x8xf32>
    %109 = arith.truncf %108 : vector<1x8x8xf32> to vector<1x8x8xbf16>
    "tpu.trace_start"() <{level = 10 : i32, message = "bts,bsd->btd"}> : () -> ()
    %cst_38 = arith.constant dense<0.000000e+00> : vector<1x8x8xf32>
    %110 = tpu.matmul %109, %95, %cst_38 {dimension_numbers = #tpu.dot_dimension_numbers<[2], [1], [1], [2], [0, 0, 0, 1, 1, 2], [0], [0]>} : vector<1x8x8xbf16>, vector<1x8x8xbf16>, vector<1x8x8xf32> -> vector<1x8x8xf32>
    "tpu.trace_stop"() : () -> ()
    %111 = vector.extract_strided_slice %45 {offsets = [0, 0, 24], sizes = [1, 8, 8], strides = [1, 1, 1]} : vector<1x8x32xf32> to vector<1x8x8xf32>
    %112 = arith.truncf %111 : vector<1x8x8xf32> to vector<1x8x8xbf16>
    %113 = vector.extract_strided_slice %46 {offsets = [0, 0, 24], sizes = [1, 8, 8], strides = [1, 1, 1]} : vector<1x8x32xf32> to vector<1x8x8xf32>
    %114 = arith.truncf %113 : vector<1x8x8xf32> to vector<1x8x8xbf16>
    %115 = vector.extract_strided_slice %47 {offsets = [0, 0, 24], sizes = [1, 8, 8], strides = [1, 1, 1]} : vector<1x8x32xf32> to vector<1x8x8xf32>
    %116 = arith.truncf %115 : vector<1x8x8xf32> to vector<1x8x8xbf16>
    "tpu.trace_start"() <{level = 10 : i32, message = "btd,bsd->bts"}> : () -> ()
    %cst_39 = arith.constant dense<0.000000e+00> : vector<1x8x8xf32>
    %117 = tpu.matmul %112, %114, %cst_39 {dimension_numbers = #tpu.dot_dimension_numbers<[2], [2], [1], [1], [0, 0, 0, 1, 1, 1], [0], [0]>} : vector<1x8x8xbf16>, vector<1x8x8xbf16>, vector<1x8x8xf32> -> vector<1x8x8xf32>
    "tpu.trace_stop"() : () -> ()
    %118 = vector.shape_cast %4 : vector<8x8xf32> to vector<1x8x8xf32>
    %119 = arith.addf %117, %118 : vector<1x8x8xf32>
    %cst_40 = arith.constant dense<0xFF800000> : vector<1x8xf32>
    %120 = vector.multi_reduction <maximumf>, %119, %cst_40 [2] : vector<1x8x8xf32> to vector<1x8xf32>
    %121 = vector.shape_cast %120 : vector<1x8xf32> to vector<1x8x1xf32>
    %122 = vector.broadcast %121 : vector<1x8x1xf32> to vector<1x8x8xf32>
    %123 = arith.subf %119, %122 : vector<1x8x8xf32>
    %124 = math.exp %123 : vector<1x8x8xf32>
    %cst_41 = arith.constant dense<0.000000e+00> : vector<1x8xf32>
    %125 = vector.multi_reduction <add>, %124, %cst_41 [2] : vector<1x8x8xf32> to vector<1x8xf32>
    %126 = vector.shape_cast %125 : vector<1x8xf32> to vector<1x8x1xf32>
    %127 = tpu.reciprocal %126 {approx = true} : vector<1x8x1xf32> -> vector<1x8x1xf32>
    %128 = vector.broadcast %127 : vector<1x8x1xf32> to vector<1x8x8xf32>
    %129 = arith.mulf %124, %128 : vector<1x8x8xf32>
    %130 = arith.truncf %129 : vector<1x8x8xf32> to vector<1x8x8xbf16>
    "tpu.trace_start"() <{level = 10 : i32, message = "bts,bsd->btd"}> : () -> ()
    %cst_42 = arith.constant dense<0.000000e+00> : vector<1x8x8xf32>
    %131 = tpu.matmul %130, %116, %cst_42 {dimension_numbers = #tpu.dot_dimension_numbers<[2], [1], [1], [2], [0, 0, 0, 1, 1, 2], [0], [0]>} : vector<1x8x8xbf16>, vector<1x8x8xbf16>, vector<1x8x8xf32> -> vector<1x8x8xf32>
    "tpu.trace_stop"() : () -> ()
    %132 = tpu.concatenate %68, %89, %110, %131 in 2 : vector<1x8x8xf32>, vector<1x8x8xf32>, vector<1x8x8xf32>, vector<1x8x8xf32> -> vector<1x8x32xf32>
    %133 = vector.shape_cast %132 : vector<1x8x32xf32> to vector<8x32xf32>
    %c0_43 = arith.constant 0 : index
    %c96 = arith.constant 96 : index
    %134 = vector.load %arg6[%c0_43, %c96] : memref<32x320xbf16, #tpu.memory_space<vmem>>, vector<32x32xbf16>
    %c0_44 = arith.constant 0 : index
    %c96_45 = arith.constant 96 : index
    %135 = vector.load %arg7[%c0_44, %c96_45] : memref<1x320xf32, #tpu.memory_space<vmem>>, vector<1x32xf32>
    %136 = arith.truncf %133 : vector<8x32xf32> to vector<8x32xbf16>
    %cst_46 = arith.constant dense<0.000000e+00> : vector<8x32xf32>
    %137 = tpu.matmul %136, %134, %cst_46 {dimension_numbers = #tpu.dot_dimension_numbers<[1], [0], [0], [1], [0, 0, 1, 1], [], []>} : vector<8x32xbf16>, vector<32x32xbf16>, vector<8x32xf32> -> vector<8x32xf32>
    %138 = vector.broadcast %135 : vector<1x32xf32> to vector<8x32xf32>
    %139 = arith.addf %137, %138 : vector<8x32xf32>
    %140 = arith.addf %1, %139 : vector<8x32xf32>
    %cst_47 = arith.constant dense<0.000000e+00> : vector<8xf32>
    %141 = vector.multi_reduction <add>, %140, %cst_47 [1] : vector<8x32xf32> to vector<8xf32>
    %142 = vector.shape_cast %141 : vector<8xf32> to vector<8x1xf32>
    %cst_48 = arith.constant 3.200000e+01 : f32
    %143 = vector.broadcast %cst_48 : f32 to vector<8x1xf32>
    %144 = arith.divf %142, %143 : vector<8x1xf32>
    %145 = vector.broadcast %144 : vector<8x1xf32> to vector<8x32xf32>
    %146 = arith.subf %140, %145 : vector<8x32xf32>
    %147 = arith.mulf %146, %146 : vector<8x32xf32>
    %cst_49 = arith.constant dense<0.000000e+00> : vector<8xf32>
    %148 = vector.multi_reduction <add>, %147, %cst_49 [1] : vector<8x32xf32> to vector<8xf32>
    %149 = vector.shape_cast %148 : vector<8xf32> to vector<8x1xf32>
    %cst_50 = arith.constant 3.200000e+01 : f32
    %150 = vector.broadcast %cst_50 : f32 to vector<8x1xf32>
    %151 = arith.divf %149, %150 : vector<8x1xf32>
    %152 = vector.broadcast %144 : vector<8x1xf32> to vector<8x32xf32>
    %153 = arith.subf %140, %152 : vector<8x32xf32>
    %cst_51 = arith.constant 9.99999974E-6 : f32
    %154 = vector.broadcast %cst_51 : f32 to vector<8x1xf32>
    %155 = arith.addf %151, %154 : vector<8x1xf32>
    %156 = math.rsqrt %155 : vector<8x1xf32>
    %157 = vector.broadcast %156 : vector<8x1xf32> to vector<8x32xf32>
    %158 = arith.mulf %153, %157 : vector<8x32xf32>
    %159 = vector.broadcast %8 : vector<1x32xf32> to vector<8x32xf32>
    %160 = arith.mulf %158, %159 : vector<8x32xf32>
    %161 = vector.broadcast %9 : vector<1x32xf32> to vector<8x32xf32>
    %162 = arith.addf %160, %161 : vector<8x32xf32>
    %c0_52 = arith.constant 0 : index
    %c128 = arith.constant 128 : index
    %163 = vector.load %arg6[%c0_52, %c128] : memref<32x320xbf16, #tpu.memory_space<vmem>>, vector<32x32xbf16>
    %c0_53 = arith.constant 0 : index
    %c128_54 = arith.constant 128 : index
    %164 = vector.load %arg7[%c0_53, %c128_54] : memref<1x320xf32, #tpu.memory_space<vmem>>, vector<1x32xf32>
    %165 = arith.truncf %162 : vector<8x32xf32> to vector<8x32xbf16>
    %cst_55 = arith.constant dense<0.000000e+00> : vector<8x32xf32>
    %166 = tpu.matmul %165, %163, %cst_55 {dimension_numbers = #tpu.dot_dimension_numbers<[1], [0], [0], [1], [0, 0, 1, 1], [], []>} : vector<8x32xbf16>, vector<32x32xbf16>, vector<8x32xf32> -> vector<8x32xf32>
    %167 = vector.broadcast %164 : vector<1x32xf32> to vector<8x32xf32>
    %168 = arith.addf %166, %167 : vector<8x32xf32>
    %c0_56 = arith.constant 0 : index
    %c160 = arith.constant 160 : index
    %169 = vector.load %arg6[%c0_56, %c160] : memref<32x320xbf16, #tpu.memory_space<vmem>>, vector<32x64xbf16>
    %c0_57 = arith.constant 0 : index
    %c160_58 = arith.constant 160 : index
    %170 = vector.load %arg7[%c0_57, %c160_58] : memref<1x320xf32, #tpu.memory_space<vmem>>, vector<1x64xf32>
    %171 = arith.truncf %3 : vector<16x32xf32> to vector<16x32xbf16>
    %cst_59 = arith.constant dense<0.000000e+00> : vector<16x64xf32>
    %172 = tpu.matmul %171, %169, %cst_59 {dimension_numbers = #tpu.dot_dimension_numbers<[1], [0], [0], [1], [0, 0, 1, 1], [], []>} : vector<16x32xbf16>, vector<32x64xbf16>, vector<16x64xf32> -> vector<16x64xf32>
    %173 = vector.broadcast %170 : vector<1x64xf32> to vector<16x64xf32>
    %174 = arith.addf %172, %173 : vector<16x64xf32>
    %175 = vector.extract_strided_slice %174 {offsets = [0, 0], sizes = [16, 32], strides = [1, 1]} : vector<16x64xf32> to vector<16x32xf32>
    %176 = vector.extract_strided_slice %174 {offsets = [0, 32], sizes = [16, 32], strides = [1, 1]} : vector<16x64xf32> to vector<16x32xf32>
    %cst_60 = arith.constant 0.353553385 : f32
    %177 = vector.broadcast %cst_60 : f32 to vector<8x32xf32>
    %178 = arith.mulf %168, %177 : vector<8x32xf32>
    %179 = vector.shape_cast %178 : vector<8x32xf32> to vector<1x8x32xf32>
    %180 = vector.shape_cast %175 : vector<16x32xf32> to vector<1x16x32xf32>
    %181 = vector.shape_cast %176 : vector<16x32xf32> to vector<1x16x32xf32>
    %182 = vector.extract_strided_slice %179 {offsets = [0, 0, 0], sizes = [1, 8, 8], strides = [1, 1, 1]} : vector<1x8x32xf32> to vector<1x8x8xf32>
    %183 = arith.truncf %182 : vector<1x8x8xf32> to vector<1x8x8xbf16>
    %184 = vector.extract_strided_slice %180 {offsets = [0, 0, 0], sizes = [1, 16, 8], strides = [1, 1, 1]} : vector<1x16x32xf32> to vector<1x16x8xf32>
    %185 = arith.truncf %184 : vector<1x16x8xf32> to vector<1x16x8xbf16>
    %186 = vector.extract_strided_slice %181 {offsets = [0, 0, 0], sizes = [1, 16, 8], strides = [1, 1, 1]} : vector<1x16x32xf32> to vector<1x16x8xf32>
    %187 = arith.truncf %186 : vector<1x16x8xf32> to vector<1x16x8xbf16>
    "tpu.trace_start"() <{level = 10 : i32, message = "btd,bsd->bts"}> : () -> ()
    %cst_61 = arith.constant dense<0.000000e+00> : vector<1x8x16xf32>
    %188 = tpu.matmul %183, %185, %cst_61 {dimension_numbers = #tpu.dot_dimension_numbers<[2], [2], [1], [1], [0, 0, 0, 1, 1, 1], [0], [0]>} : vector<1x8x8xbf16>, vector<1x16x8xbf16>, vector<1x8x16xf32> -> vector<1x8x16xf32>
    "tpu.trace_stop"() : () -> ()
    %189 = vector.broadcast %5 : vector<1x1x16xf32> to vector<1x8x16xf32>
    %190 = arith.addf %188, %189 : vector<1x8x16xf32>
    %cst_62 = arith.constant dense<0xFF800000> : vector<1x8xf32>
    %191 = vector.multi_reduction <maximumf>, %190, %cst_62 [2] : vector<1x8x16xf32> to vector<1x8xf32>
    %192 = vector.shape_cast %191 : vector<1x8xf32> to vector<1x8x1xf32>
    %193 = vector.broadcast %192 : vector<1x8x1xf32> to vector<1x8x16xf32>
    %194 = arith.subf %190, %193 : vector<1x8x16xf32>
    %195 = math.exp %194 : vector<1x8x16xf32>
    %cst_63 = arith.constant dense<0.000000e+00> : vector<1x8xf32>
    %196 = vector.multi_reduction <add>, %195, %cst_63 [2] : vector<1x8x16xf32> to vector<1x8xf32>
    %197 = vector.shape_cast %196 : vector<1x8xf32> to vector<1x8x1xf32>
    %198 = tpu.reciprocal %197 {approx = true} : vector<1x8x1xf32> -> vector<1x8x1xf32>
    %199 = vector.broadcast %198 : vector<1x8x1xf32> to vector<1x8x16xf32>
    %200 = arith.mulf %195, %199 : vector<1x8x16xf32>
    %201 = arith.truncf %200 : vector<1x8x16xf32> to vector<1x8x16xbf16>
    "tpu.trace_start"() <{level = 10 : i32, message = "bts,bsd->btd"}> : () -> ()
    %cst_64 = arith.constant dense<0.000000e+00> : vector<1x8x8xf32>
    %202 = tpu.matmul %201, %187, %cst_64 {dimension_numbers = #tpu.dot_dimension_numbers<[2], [1], [1], [2], [0, 0, 0, 1, 1, 2], [0], [0]>} : vector<1x8x16xbf16>, vector<1x16x8xbf16>, vector<1x8x8xf32> -> vector<1x8x8xf32>
    "tpu.trace_stop"() : () -> ()
    %203 = vector.extract_strided_slice %179 {offsets = [0, 0, 8], sizes = [1, 8, 8], strides = [1, 1, 1]} : vector<1x8x32xf32> to vector<1x8x8xf32>
    %204 = arith.truncf %203 : vector<1x8x8xf32> to vector<1x8x8xbf16>
    %205 = vector.extract_strided_slice %180 {offsets = [0, 0, 8], sizes = [1, 16, 8], strides = [1, 1, 1]} : vector<1x16x32xf32> to vector<1x16x8xf32>
    %206 = arith.truncf %205 : vector<1x16x8xf32> to vector<1x16x8xbf16>
    %207 = vector.extract_strided_slice %181 {offsets = [0, 0, 8], sizes = [1, 16, 8], strides = [1, 1, 1]} : vector<1x16x32xf32> to vector<1x16x8xf32>
    %208 = arith.truncf %207 : vector<1x16x8xf32> to vector<1x16x8xbf16>
    "tpu.trace_start"() <{level = 10 : i32, message = "btd,bsd->bts"}> : () -> ()
    %cst_65 = arith.constant dense<0.000000e+00> : vector<1x8x16xf32>
    %209 = tpu.matmul %204, %206, %cst_65 {dimension_numbers = #tpu.dot_dimension_numbers<[2], [2], [1], [1], [0, 0, 0, 1, 1, 1], [0], [0]>} : vector<1x8x8xbf16>, vector<1x16x8xbf16>, vector<1x8x16xf32> -> vector<1x8x16xf32>
    "tpu.trace_stop"() : () -> ()
    %210 = vector.broadcast %5 : vector<1x1x16xf32> to vector<1x8x16xf32>
    %211 = arith.addf %209, %210 : vector<1x8x16xf32>
    %cst_66 = arith.constant dense<0xFF800000> : vector<1x8xf32>
    %212 = vector.multi_reduction <maximumf>, %211, %cst_66 [2] : vector<1x8x16xf32> to vector<1x8xf32>
    %213 = vector.shape_cast %212 : vector<1x8xf32> to vector<1x8x1xf32>
    %214 = vector.broadcast %213 : vector<1x8x1xf32> to vector<1x8x16xf32>
    %215 = arith.subf %211, %214 : vector<1x8x16xf32>
    %216 = math.exp %215 : vector<1x8x16xf32>
    %cst_67 = arith.constant dense<0.000000e+00> : vector<1x8xf32>
    %217 = vector.multi_reduction <add>, %216, %cst_67 [2] : vector<1x8x16xf32> to vector<1x8xf32>
    %218 = vector.shape_cast %217 : vector<1x8xf32> to vector<1x8x1xf32>
    %219 = tpu.reciprocal %218 {approx = true} : vector<1x8x1xf32> -> vector<1x8x1xf32>
    %220 = vector.broadcast %219 : vector<1x8x1xf32> to vector<1x8x16xf32>
    %221 = arith.mulf %216, %220 : vector<1x8x16xf32>
    %222 = arith.truncf %221 : vector<1x8x16xf32> to vector<1x8x16xbf16>
    "tpu.trace_start"() <{level = 10 : i32, message = "bts,bsd->btd"}> : () -> ()
    %cst_68 = arith.constant dense<0.000000e+00> : vector<1x8x8xf32>
    %223 = tpu.matmul %222, %208, %cst_68 {dimension_numbers = #tpu.dot_dimension_numbers<[2], [1], [1], [2], [0, 0, 0, 1, 1, 2], [0], [0]>} : vector<1x8x16xbf16>, vector<1x16x8xbf16>, vector<1x8x8xf32> -> vector<1x8x8xf32>
    "tpu.trace_stop"() : () -> ()
    %224 = vector.extract_strided_slice %179 {offsets = [0, 0, 16], sizes = [1, 8, 8], strides = [1, 1, 1]} : vector<1x8x32xf32> to vector<1x8x8xf32>
    %225 = arith.truncf %224 : vector<1x8x8xf32> to vector<1x8x8xbf16>
    %226 = vector.extract_strided_slice %180 {offsets = [0, 0, 16], sizes = [1, 16, 8], strides = [1, 1, 1]} : vector<1x16x32xf32> to vector<1x16x8xf32>
    %227 = arith.truncf %226 : vector<1x16x8xf32> to vector<1x16x8xbf16>
    %228 = vector.extract_strided_slice %181 {offsets = [0, 0, 16], sizes = [1, 16, 8], strides = [1, 1, 1]} : vector<1x16x32xf32> to vector<1x16x8xf32>
    %229 = arith.truncf %228 : vector<1x16x8xf32> to vector<1x16x8xbf16>
    "tpu.trace_start"() <{level = 10 : i32, message = "btd,bsd->bts"}> : () -> ()
    %cst_69 = arith.constant dense<0.000000e+00> : vector<1x8x16xf32>
    %230 = tpu.matmul %225, %227, %cst_69 {dimension_numbers = #tpu.dot_dimension_numbers<[2], [2], [1], [1], [0, 0, 0, 1, 1, 1], [0], [0]>} : vector<1x8x8xbf16>, vector<1x16x8xbf16>, vector<1x8x16xf32> -> vector<1x8x16xf32>
    "tpu.trace_stop"() : () -> ()
    %231 = vector.broadcast %5 : vector<1x1x16xf32> to vector<1x8x16xf32>
    %232 = arith.addf %230, %231 : vector<1x8x16xf32>
    %cst_70 = arith.constant dense<0xFF800000> : vector<1x8xf32>
    %233 = vector.multi_reduction <maximumf>, %232, %cst_70 [2] : vector<1x8x16xf32> to vector<1x8xf32>
    %234 = vector.shape_cast %233 : vector<1x8xf32> to vector<1x8x1xf32>
    %235 = vector.broadcast %234 : vector<1x8x1xf32> to vector<1x8x16xf32>
    %236 = arith.subf %232, %235 : vector<1x8x16xf32>
    %237 = math.exp %236 : vector<1x8x16xf32>
    %cst_71 = arith.constant dense<0.000000e+00> : vector<1x8xf32>
    %238 = vector.multi_reduction <add>, %237, %cst_71 [2] : vector<1x8x16xf32> to vector<1x8xf32>
    %239 = vector.shape_cast %238 : vector<1x8xf32> to vector<1x8x1xf32>
    %240 = tpu.reciprocal %239 {approx = true} : vector<1x8x1xf32> -> vector<1x8x1xf32>
    %241 = vector.broadcast %240 : vector<1x8x1xf32> to vector<1x8x16xf32>
    %242 = arith.mulf %237, %241 : vector<1x8x16xf32>
    %243 = arith.truncf %242 : vector<1x8x16xf32> to vector<1x8x16xbf16>
    "tpu.trace_start"() <{level = 10 : i32, message = "bts,bsd->btd"}> : () -> ()
    %cst_72 = arith.constant dense<0.000000e+00> : vector<1x8x8xf32>
    %244 = tpu.matmul %243, %229, %cst_72 {dimension_numbers = #tpu.dot_dimension_numbers<[2], [1], [1], [2], [0, 0, 0, 1, 1, 2], [0], [0]>} : vector<1x8x16xbf16>, vector<1x16x8xbf16>, vector<1x8x8xf32> -> vector<1x8x8xf32>
    "tpu.trace_stop"() : () -> ()
    %245 = vector.extract_strided_slice %179 {offsets = [0, 0, 24], sizes = [1, 8, 8], strides = [1, 1, 1]} : vector<1x8x32xf32> to vector<1x8x8xf32>
    %246 = arith.truncf %245 : vector<1x8x8xf32> to vector<1x8x8xbf16>
    %247 = vector.extract_strided_slice %180 {offsets = [0, 0, 24], sizes = [1, 16, 8], strides = [1, 1, 1]} : vector<1x16x32xf32> to vector<1x16x8xf32>
    %248 = arith.truncf %247 : vector<1x16x8xf32> to vector<1x16x8xbf16>
    %249 = vector.extract_strided_slice %181 {offsets = [0, 0, 24], sizes = [1, 16, 8], strides = [1, 1, 1]} : vector<1x16x32xf32> to vector<1x16x8xf32>
    %250 = arith.truncf %249 : vector<1x16x8xf32> to vector<1x16x8xbf16>
    "tpu.trace_start"() <{level = 10 : i32, message = "btd,bsd->bts"}> : () -> ()
    %cst_73 = arith.constant dense<0.000000e+00> : vector<1x8x16xf32>
    %251 = tpu.matmul %246, %248, %cst_73 {dimension_numbers = #tpu.dot_dimension_numbers<[2], [2], [1], [1], [0, 0, 0, 1, 1, 1], [0], [0]>} : vector<1x8x8xbf16>, vector<1x16x8xbf16>, vector<1x8x16xf32> -> vector<1x8x16xf32>
    "tpu.trace_stop"() : () -> ()
    %252 = vector.broadcast %5 : vector<1x1x16xf32> to vector<1x8x16xf32>
    %253 = arith.addf %251, %252 : vector<1x8x16xf32>
    %cst_74 = arith.constant dense<0xFF800000> : vector<1x8xf32>
    %254 = vector.multi_reduction <maximumf>, %253, %cst_74 [2] : vector<1x8x16xf32> to vector<1x8xf32>
    %255 = vector.shape_cast %254 : vector<1x8xf32> to vector<1x8x1xf32>
    %256 = vector.broadcast %255 : vector<1x8x1xf32> to vector<1x8x16xf32>
    %257 = arith.subf %253, %256 : vector<1x8x16xf32>
    %258 = math.exp %257 : vector<1x8x16xf32>
    %cst_75 = arith.constant dense<0.000000e+00> : vector<1x8xf32>
    %259 = vector.multi_reduction <add>, %258, %cst_75 [2] : vector<1x8x16xf32> to vector<1x8xf32>
    %260 = vector.shape_cast %259 : vector<1x8xf32> to vector<1x8x1xf32>
    %261 = tpu.reciprocal %260 {approx = true} : vector<1x8x1xf32> -> vector<1x8x1xf32>
    %262 = vector.broadcast %261 : vector<1x8x1xf32> to vector<1x8x16xf32>
    %263 = arith.mulf %258, %262 : vector<1x8x16xf32>
    %264 = arith.truncf %263 : vector<1x8x16xf32> to vector<1x8x16xbf16>
    "tpu.trace_start"() <{level = 10 : i32, message = "bts,bsd->btd"}> : () -> ()
    %cst_76 = arith.constant dense<0.000000e+00> : vector<1x8x8xf32>
    %265 = tpu.matmul %264, %250, %cst_76 {dimension_numbers = #tpu.dot_dimension_numbers<[2], [1], [1], [2], [0, 0, 0, 1, 1, 2], [0], [0]>} : vector<1x8x16xbf16>, vector<1x16x8xbf16>, vector<1x8x8xf32> -> vector<1x8x8xf32>
    "tpu.trace_stop"() : () -> ()
    %266 = tpu.concatenate %202, %223, %244, %265 in 2 : vector<1x8x8xf32>, vector<1x8x8xf32>, vector<1x8x8xf32>, vector<1x8x8xf32> -> vector<1x8x32xf32>
    %267 = vector.shape_cast %266 : vector<1x8x32xf32> to vector<8x32xf32>
    %c0_77 = arith.constant 0 : index
    %c224 = arith.constant 224 : index
    %268 = vector.load %arg6[%c0_77, %c224] : memref<32x320xbf16, #tpu.memory_space<vmem>>, vector<32x32xbf16>
    %c0_78 = arith.constant 0 : index
    %c224_79 = arith.constant 224 : index
    %269 = vector.load %arg7[%c0_78, %c224_79] : memref<1x320xf32, #tpu.memory_space<vmem>>, vector<1x32xf32>
    %270 = arith.truncf %267 : vector<8x32xf32> to vector<8x32xbf16>
    %cst_80 = arith.constant dense<0.000000e+00> : vector<8x32xf32>
    %271 = tpu.matmul %270, %268, %cst_80 {dimension_numbers = #tpu.dot_dimension_numbers<[1], [0], [0], [1], [0, 0, 1, 1], [], []>} : vector<8x32xbf16>, vector<32x32xbf16>, vector<8x32xf32> -> vector<8x32xf32>
    %272 = vector.broadcast %269 : vector<1x32xf32> to vector<8x32xf32>
    %273 = arith.addf %271, %272 : vector<8x32xf32>
    %274 = arith.addf %140, %273 : vector<8x32xf32>
    %cst_81 = arith.constant dense<0.000000e+00> : vector<8xf32>
    %275 = vector.multi_reduction <add>, %274, %cst_81 [1] : vector<8x32xf32> to vector<8xf32>
    %276 = vector.shape_cast %275 : vector<8xf32> to vector<8x1xf32>
    %cst_82 = arith.constant 3.200000e+01 : f32
    %277 = vector.broadcast %cst_82 : f32 to vector<8x1xf32>
    %278 = arith.divf %276, %277 : vector<8x1xf32>
    %279 = vector.broadcast %278 : vector<8x1xf32> to vector<8x32xf32>
    %280 = arith.subf %274, %279 : vector<8x32xf32>
    %281 = arith.mulf %280, %280 : vector<8x32xf32>
    %cst_83 = arith.constant dense<0.000000e+00> : vector<8xf32>
    %282 = vector.multi_reduction <add>, %281, %cst_83 [1] : vector<8x32xf32> to vector<8xf32>
    %283 = vector.shape_cast %282 : vector<8xf32> to vector<8x1xf32>
    %cst_84 = arith.constant 3.200000e+01 : f32
    %284 = vector.broadcast %cst_84 : f32 to vector<8x1xf32>
    %285 = arith.divf %283, %284 : vector<8x1xf32>
    %286 = vector.broadcast %278 : vector<8x1xf32> to vector<8x32xf32>
    %287 = arith.subf %274, %286 : vector<8x32xf32>
    %cst_85 = arith.constant 9.99999974E-6 : f32
    %288 = vector.broadcast %cst_85 : f32 to vector<8x1xf32>
    %289 = arith.addf %285, %288 : vector<8x1xf32>
    %290 = math.rsqrt %289 : vector<8x1xf32>
    %291 = vector.broadcast %290 : vector<8x1xf32> to vector<8x32xf32>
    %292 = arith.mulf %287, %291 : vector<8x32xf32>
    %293 = vector.broadcast %10 : vector<1x32xf32> to vector<8x32xf32>
    %294 = arith.mulf %292, %293 : vector<8x32xf32>
    %295 = vector.broadcast %11 : vector<1x32xf32> to vector<8x32xf32>
    %296 = arith.addf %294, %295 : vector<8x32xf32>
    %c0_86 = arith.constant 0 : index
    %c256 = arith.constant 256 : index
    %297 = vector.load %arg6[%c0_86, %c256] : memref<32x320xbf16, #tpu.memory_space<vmem>>, vector<32x32xbf16>
    %c0_87 = arith.constant 0 : index
    %c256_88 = arith.constant 256 : index
    %298 = vector.load %arg7[%c0_87, %c256_88] : memref<1x320xf32, #tpu.memory_space<vmem>>, vector<1x32xf32>
    %299 = arith.truncf %296 : vector<8x32xf32> to vector<8x32xbf16>
    %cst_89 = arith.constant dense<0.000000e+00> : vector<8x32xf32>
    %300 = tpu.matmul %299, %297, %cst_89 {dimension_numbers = #tpu.dot_dimension_numbers<[1], [0], [0], [1], [0, 0, 1, 1], [], []>} : vector<8x32xbf16>, vector<32x32xbf16>, vector<8x32xf32> -> vector<8x32xf32>
    %301 = vector.broadcast %298 : vector<1x32xf32> to vector<8x32xf32>
    %302 = arith.addf %300, %301 : vector<8x32xf32>
    %cst_90 = arith.constant 0.000000e+00 : f32
    %303 = vector.broadcast %cst_90 : f32 to vector<8x32xf32>
    %304 = arith.maximumf %302, %303 : vector<8x32xf32>
    %c0_91 = arith.constant 0 : index
    %c288 = arith.constant 288 : index
    %305 = vector.load %arg6[%c0_91, %c288] : memref<32x320xbf16, #tpu.memory_space<vmem>>, vector<32x32xbf16>
    %c0_92 = arith.constant 0 : index
    %c288_93 = arith.constant 288 : index
    %306 = vector.load %arg7[%c0_92, %c288_93] : memref<1x320xf32, #tpu.memory_space<vmem>>, vector<1x32xf32>
    %307 = arith.truncf %304 : vector<8x32xf32> to vector<8x32xbf16>
    %cst_94 = arith.constant dense<0.000000e+00> : vector<8x32xf32>
    %308 = tpu.matmul %307, %305, %cst_94 {dimension_numbers = #tpu.dot_dimension_numbers<[1], [0], [0], [1], [0, 0, 1, 1], [], []>} : vector<8x32xbf16>, vector<32x32xbf16>, vector<8x32xf32> -> vector<8x32xf32>
    %309 = vector.broadcast %306 : vector<1x32xf32> to vector<8x32xf32>
    %310 = arith.addf %308, %309 : vector<8x32xf32>
    %311 = arith.addf %274, %310 : vector<8x32xf32>
    %312 = vector.shape_cast %311 : vector<8x32xf32> to vector<1x8x32xf32>
    %c0_95 = arith.constant 0 : index
    %c0_96 = arith.constant 0 : index
    %c0_97 = arith.constant 0 : index
    %313 = vector.load %arg8[%c0_95, %c0_96, %c0_97] : memref<1x8x32xf32, #tpu.memory_space<vmem>>, vector<1x8x32xf32>
    tpu.vector_store %arg8[%c0_95, %c0_96, %c0_97], %312 {strides = array<i32>} : memref<1x8x32xf32, #tpu.memory_space<vmem>>, vector<1x8x32xf32>,
    return
  }
  func.func @transform_0(%arg0: i32) -> (i32, i32, i32) {
    %c0_i32 = arith.constant 0 : i32
    %c0_i32_0 = arith.constant 0 : i32
    %c0_i32_1 = arith.constant 0 : i32
    return %arg0, %c0_i32, %c0_i32_0 : i32, i32, i32
  }
  func.func @transform_1(%arg0: i32) -> (i32, i32, i32) {
    %c0_i32 = arith.constant 0 : i32
    %c0_i32_0 = arith.constant 0 : i32
    %c0_i32_1 = arith.constant 0 : i32
    return %arg0, %c0_i32, %c0_i32_0 : i32, i32, i32
  }
  func.func @transform_2(%arg0: i32) -> (i32, i32) {
    %c0_i32 = arith.constant 0 : i32
    %c0_i32_0 = arith.constant 0 : i32
    %c0_i32_1 = arith.constant 0 : i32
    return %c0_i32, %c0_i32_0 : i32, i32
  }
  func.func @transform_3(%arg0: i32) -> (i32, i32, i32) {
    %c0_i32 = arith.constant 0 : i32
    %c0_i32_0 = arith.constant 0 : i32
    %c0_i32_1 = arith.constant 0 : i32
    return %arg0, %c0_i32, %c0_i32_0 : i32, i32, i32
  }
  func.func @transform_4(%arg0: i32) -> (i32, i32) {
    %c0_i32 = arith.constant 0 : i32
    %c0_i32_0 = arith.constant 0 : i32
    %c0_i32_1 = arith.constant 0 : i32
    return %c0_i32, %c0_i32_0 : i32, i32
  }
  func.func @transform_5(%arg0: i32) -> (i32, i32) {
    %c0_i32 = arith.constant 0 : i32
    %c0_i32_0 = arith.constant 0 : i32
    %c0_i32_1 = arith.constant 0 : i32
    return %c0_i32, %c0_i32_0 : i32, i32
  }
  func.func @transform_6(%arg0: i32) -> (i32, i32) {
    %c0_i32 = arith.constant 0 : i32
    %c0_i32_0 = arith.constant 0 : i32
    %c0_i32_1 = arith.constant 0 : i32
    return %c0_i32, %c0_i32_0 : i32, i32
  }
  func.func @transform_7(%arg0: i32) -> (i32, i32, i32) {
    %c0_i32 = arith.constant 0 : i32
    %c0_i32_0 = arith.constant 0 : i32
    %c0_i32_1 = arith.constant 0 : i32
    return %arg0, %c0_i32, %c0_i32_0 : i32, i32, i32
  }
}

</mosaic_0001>

<bundles_post_ra>
// kernel: tpu_custom_call.1
= control target key start
LH: loop header
LB: loop body
LE: loop exit
PB: predicated region body
PF: predicated region fallthrough
CT: control target
= control target key end

     0   :  { %s3424_s0 = inlined_call_operand.hbm [shape: f32[2,8,32], index: 0, kind: input, shape index: {}]   ;;  %s3425_s1 = inlined_call_operand.hbm [shape: f32[2,16,32], index: 1, kind: input, shape index: {}]   ;;  %s3426_s2 = inlined_call_operand.hbm [shape: f32[8,8], index: 2, kind: input, shape index: {}]   ;;  %s3427_s3 = inlined_call_operand.hbm [shape: f32[2,1,16], index: 3, kind: input, shape index: {}]   ;;  %s3428_s4 = inlined_call_operand.hbm [shape: f32[6,32], index: 4, kind: input, shape index: {}]   ;;  %s3429_s5 = inlined_call_operand.hbm [shape: bf16[32,320], index: 5, kind: input, shape index: {}]   ;;  %s3430_s6 = inlined_call_operand.hbm [shape: f32[1,320], index: 6, kind: input, shape index: {}]   ;;  %s3431_s7 = inlined_call_operand.hbm [shape: f32[2,8,32], index: 7, kind: output, shape index: {}]  }
   0x1   :  { %3437 = sst [smem:[#allocation22_spill]] %s3424_s0 }
   0x2   :  { %3438 = sst [smem:[#allocation23_spill]] %s3425_s1 }
   0x3   :  { %3439 = sst [smem:[#allocation24_spill]] %s3426_s2 }
   0x4   :  { %3440 = sst [smem:[#allocation25_spill]] %s3428_s4 }
   0x5   :  { %3441 = sst [smem:[#allocation26_spill]] %s3429_s5 }
   0x6   :  { %12 = vsyncpa [#allocation3], 0 }
   0x7   :  { %14 = vsyncpa [#allocation3 + $0x1], 0 }
   0x8   :  { %15 = vsyncpa [#allocation6], 0 }
   0x9   :  { %17 = vsyncpa [#allocation6 + $0x1], 0 }
   0xa   :  { %18 = vsyncpa [#allocation9], 0 }
   0xb   :  { %20 = vsyncpa [#allocation9 + $0x1], 0 }
   0xc   :  { %21 = vsyncpa [#allocation12], 0 }
   0xd   :  { %22 = vsyncpa [#allocation4], 0 }
   0xe   :  { %24 = vsyncpa [#allocation4 + $0x1], 0  ;;  %s2842_s24 = smov 0   ;;  %s2844_s25 = smov 0  }
   0xf   :  { %s2846_s26 = smov 0   ;;  %s2848_s27 = smov 0  }
  0x10 LB: > { %s2773_s28 = smov [#allocation7]   ;;  %s2863_s30 = sadd.s32 4294967295, %s2771_s27   ;;  %s2771_s27 = sphi %s2848_s27, %s3474_s27   ;;  %s2767_s26 = sphi %s2846_s26, %s3473_s26   ;;  %s2763_s25 = sphi %s2844_s25, %s3472_s25   ;;  %s2759_s24 = sphi %s2842_s24, %s3471_s24  }
  0x11   : > { %s236_s29 = sshll.u32 %s2773_s28, 4  ;;  %p2042_p0 = scmp.ge.s32.totalorder %s2771_s27, 1  ;;  %s237_s29 = int_to_ptr.vmem [resolvable:$true] %s236_s29 }
  0x12   : > { %p3432_p1 = scmp.eq.s32.totalorder %s2863_s30, 0  ;;  %p223_p2 = scmp.lt.s32.totalorder %s2771_s27, 3 }
  0x13   : > { %s2774_s9 = smov [#allocation10]   ;;  %s2775_s11 = smov [#allocation11]  }
  0x14   : > { %p2868_p3 = pnand %p2042_p0, %p223_p2  ;;  %s247_s10 = sshll.u32 %s2774_s9, 4  ;;  %s2875_s10 = int_to_ptr.vmem [resolvable:$true] %s247_s10 }
  0x15   : > { %s257_s12 = sshll.u32 %s2775_s11, 4  ;;  %s3444_s2 = sld [smem:[#allocation24_spill]]  ;;  %s2883_s12 = int_to_ptr.vmem [resolvable:$true] %s257_s12 }
  0x16   : > { %s3442_s8 = scalar_select %p2868_p3, 1, 0 }
  0x17   : > { %p2341_p5 = pneg %p2868_p3 }
  0x19   : > { %p2879_p6 = pnand %p2341_p5, %p3432_p1 }
  0x1b   : > { %s2483_s16 = scalar_lea.hbm %s3444_s2, 128  ;;  %p2893_p8 = pneg %p2879_p6 }
  0x1c   : > { %p2484_p7 = scmp.ne.s32.totalorder %s3444_s2, %s2483_s16  ;;  %p2490_p11 = scmp.lt.u32.totalorder %s2483_s16, %s3444_s2 }
  0x1e   : > { %p2486_p9 = pnand %p2893_p8, %p2484_p7 }
  0x20   : > { %p2487_p10 = pneg %p2486_p9 }
  0x22   : > { %p2492_p12 = pnand %p2490_p11, %p2487_p10 }
  0x24   : > { %2495 = shalt.err (!%p2492_p12)
}
  0x25   : > { %s2496_s22 = scalar_lea.vmem %s237_s29, 128  ;;  %p2504_p5 = scmp.lt.s32.totalorder %s237_s29, %s237_s29 }
  0x26   : > { %p2497_p13 = scmp.ne.s32.totalorder %s237_s29, %s2496_s22  ;;  %p2505_p4 = scmp.lt.s32.totalorder %s2496_s22, %s2496_s22 }
  0x28   : > { %p2499_p0 = pnand %p2497_p13, %p2893_p8  ;;  %p2506_p1 = por %p2505_p4, %p2504_p5 }
  0x2a   : > { %p2500_p2 = pneg %p2499_p0 }
  0x2c   : > { %p2507_p3 = pnand %p2506_p1, %p2500_p2 }
  0x2e   : > { %2510 = shalt.err (!%p2507_p3)
}
  0x2f   : > { %2344 = dma.hbm_to_vmem [thread:$0]  (!%p2879_p6), %s3444_s2, 128, %s237_s29, [#allocation6]  }
  0x30   : > { %s3446_s4 = sld [smem:[#allocation25_spill]] }
  0x36   : > { %s2511_s14 = scalar_lea.hbm %s3446_s4, 128 }
  0x37   : > { %p2512_p7 = scmp.ne.s32.totalorder %s3446_s4, %s2511_s14  ;;  %p2518_p1 = scmp.lt.u32.totalorder %s2511_s14, %s3446_s4 }
  0x39   : > { %p2514_p9 = pnand %p2512_p7, %p2893_p8 }
  0x3b   : > { %p2515_p4 = pneg %p2514_p9 }
  0x3d   : > { %p2520_p3 = pnand %p2518_p1, %p2515_p4 }
  0x3f   : > { %2523 = shalt.err (!%p2520_p3)
}
  0x40   : > { %s2524_s29 = scalar_lea.vmem %s2875_s10, 128  ;;  %p2532_p13 = scmp.lt.s32.totalorder %s2875_s10, %s2875_s10 }
  0x41   : > { %p2525_p10 = scmp.ne.s32.totalorder %s2875_s10, %s2524_s29  ;;  %p2533_p0 = scmp.lt.s32.totalorder %s2524_s29, %s2524_s29 }
  0x43   : > { %p2527_p11 = pnand %p2525_p10, %p2893_p8  ;;  %p2534_p2 = por %p2533_p0, %p2532_p13 }
  0x45   : > { %p2528_p12 = pneg %p2527_p11 }
  0x47   : > { %p2535_p5 = pnand %p2534_p2, %p2528_p12 }
  0x49   : > { %2538 = shalt.err (!%p2535_p5)
}
  0x4a   : > { %2347 = dma.hbm_to_vmem [thread:$0]  (!%p2879_p6), %s3446_s4, 128, %s2875_s10, [#allocation9]  }
  0x4b   : > { %s3447_s5 = sld [smem:[#allocation26_spill]] }
  0x51   : > { %s2539_s28 = scalar_lea.hbm %s3447_s5, 768 }
  0x52   : > { %p2540_p7 = scmp.ne.s32.totalorder %s3447_s5, %s2539_s28  ;;  %p2546_p1 = scmp.lt.u32.totalorder %s2539_s28, %s3447_s5 }
  0x54   : > { %p2542_p9 = pnand %p2540_p7, %p2893_p8 }
  0x56   : > { %p2543_p4 = pneg %p2542_p9 }
  0x58   : > { %p2548_p3 = pnand %p2546_p1, %p2543_p4 }
  0x5a   : > { %2551 = shalt.err (!%p2548_p3)
}
  0x5b   : > { %s2552_s10 = scalar_lea.vmem %s2883_s12, 768  ;;  %p2560_p13 = scmp.lt.s32.totalorder %s2883_s12, %s2883_s12 }
  0x5c   : > { %p2553_p10 = scmp.ne.s32.totalorder %s2883_s12, %s2552_s10  ;;  %p2561_p0 = scmp.lt.s32.totalorder %s2552_s10, %s2552_s10 }
  0x5e   : > { %p2555_p11 = pnand %p2553_p10, %p2893_p8  ;;  %p2562_p2 = por %p2561_p0, %p2560_p13 }
  0x60   : > { %p2556_p12 = pneg %p2555_p11 }
  0x62   : > { %p2563_p5 = pnand %p2562_p2, %p2556_p12 }
  0x64   : > { %2566 = shalt.err (!%p2563_p5)
}
  0x65   : > { %s2776_s16 = smov 192   ;;  %s2777_s17 = smov 12  }
  0x66   : > { %2350 = dma.hbm_to_vmem [thread:$0]  (!%p2879_p6), %s3447_s5, 768, %s2883_s12, [#allocation12], %s2776_s16, %s2776_s16, %s2777_s17  }
  0x67   : > { %s2778_s20 = smov [#allocation13]   ;;  %s2567_s28 = scalar_lea.hbm %s3430_s6, 48 }
  0x68   : > { %s271_s21 = sshll.u32 %s2778_s20, 4  ;;  %p2568_p7 = scmp.ne.s32.totalorder %s3430_s6, %s2567_s28  ;;  %s272_s21 = int_to_ptr.vmem [resolvable:$true] %s271_s21 }
  0x69   : > { %p2574_p1 = scmp.lt.u32.totalorder %s2567_s28, %s3430_s6 }
  0x6a   : > { %p2570_p9 = pnand %p2568_p7, %p2893_p8 }
  0x6c   : > { %p2571_p4 = pneg %p2570_p9 }
  0x6e   : > { %p2576_p3 = pnand %p2574_p1, %p2571_p4 }
  0x70   : > { %2579 = shalt.err (!%p2576_p3)
}
  0x71   : > { %s2580_s12 = scalar_lea.vmem %s272_s21, 48  ;;  %s2587_s10 = scalar_lea.vmem %s272_s21, 64 }
  0x72   : > { %p2581_p10 = scmp.ne.s32.totalorder %s272_s21, %s2580_s12  ;;  %p2588_p13 = scmp.lt.s32.totalorder %s272_s21, %s272_s21 }
  0x73   : > { %p2589_p0 = scmp.lt.s32.totalorder %s2587_s10, %s2580_s12 }
  0x74   : > { %p2583_p11 = pnand %p2581_p10, %p2893_p8 }
  0x75   : > { %p2590_p2 = por %p2589_p0, %p2588_p13 }
  0x76   : > { %p2584_p12 = pneg %p2583_p11 }
  0x78   : > { %p2591_p5 = pnand %p2590_p2, %p2584_p12 }
  0x7a   : > { %2594 = shalt.err (!%p2591_p5)
}
  0x7b   : > { %2353 = dma.hbm_to_vmem [thread:$0]  (!%p2879_p6), %s3430_s6, 48, %s272_s21, [#allocation12]  }
  0x7c   : > { %s2041_s19 = sadd.s32 4294967294, %s2771_s27   ;;  %s2975_s13 = sadd.s32 1, %s2771_s27  }
  0x7d   : > { %s34_s18 = ssub.s32 %s2771_s27, %s2975_s13  ;;  %s37_s29 = sadd.s32 1, %s2767_s26 }
  0x7e   : > { %p35_p8 = scmp.eq.s32.totalorder %s34_s18, 0  ;;  %p44_p7 = scmp.ne.s32.totalorder %s2767_s26, %s2763_s25 }
  0x7f   : > { %p45_p9 = scmp.eq.s32.totalorder %s2771_s27, 0  ;;  %p50_p4 = scmp.ne.s32.totalorder %s2763_s25, %s2759_s24 }
  0x80   : > { %s2986_s20 = scalar_select %p35_p8, %s2767_s26, %s37_s29  }
  0x81   : > { %p2988_p1 = por %p45_p9, %p44_p7  ;;  %p3449_p3 = scmp.eq.s32.totalorder %s2863_s30, 0 }
  0x82   : > { %p210_p10 = scmp.eq.s32.totalorder %s2863_s30, 1  ;;  %p216_p11 = scmp.eq.s32.totalorder %s2041_s19, 1 }
  0x83   : > { %p2994_p6 = por %p3449_p3, %p50_p4  ;;  %p2372_p12 = scmp.lt.s32.totalorder %s2771_s27, 2 }
  0x84   : > { %s3001_s23 = sand.u32 1, %s2767_s26   ;;  %p3003_p13 = por %p210_p10, %p44_p7 }
  0x85   : > { %s3450_s21 = scalar_select %p2994_p6, 1, 0 }
  0x86   : > { %s3451_s28 = scalar_select %p3003_p13, 1, 0 }
  0x87   : > { %p3007_p0 = por %p216_p11, %p50_p4  ;;  %s2048_s11 = sshll.u32 %s3001_s23, 3 }
  0x88   : > { %s2049_s14 = sshll.u32 %s2771_s27, 7  ;;  %s3453_s0 = sld [smem:[#allocation22_spill]] }
  0x89   : > { %s3452_s9 = scalar_select %p3007_p0, 1, 0 }
  0x8a   : > { %s286_s16 = scalar_lea.vmem [#allocation2], %s2048_s11  ;;  %p3022_p2 = pnand %p2372_p12, %p2988_p1 }
  0x8b   : > { %s293_s17 = sshll.u32 %s286_s16, 4  ;;  %s2050_s18 = sshll.u32 %s3001_s23, 4  ;;  %s3018_s17 = int_to_ptr.vmem [resolvable:$true] %s293_s17 }
  0x8c   : > { %s3454_s19 = scalar_select %p3022_p2, 1, 0 }
  0x8d   : > { %s283_s2 = scalar_lea.sflag [#allocation3], %s3001_s23  ;;  %p3033_p8 = pneg %p3022_p2 }
  0x8e   : > { %s3016_s10 = scalar_lea.hbm %s3453_s0, %s2049_s14  ;;  %s2600_s12 = scalar_lea.hbm %s3453_s0, 256 }
  0x8f   : > { %s2595_s15 = scalar_lea.hbm %s3016_s10, 128  ;;  %p2601_p4 = scmp.lt.u32.totalorder %s3016_s10, %s3453_s0 }
  0x90   : > { %p2596_p5 = scmp.ne.s32.totalorder %s3016_s10, %s2595_s15  ;;  %p2602_p1 = scmp.lt.u32.totalorder %s2600_s12, %s2595_s15 }
  0x91   : > { %p2604_p10 = scmp.lt.u32.totalorder %s2595_s15, %s3016_s10 }
  0x92   : > { %p2598_p7 = pnand %p3033_p8, %p2596_p5  ;;  %p2603_p3 = por %p2602_p1, %p2601_p4 }
  0x94   : > { %p2599_p9 = pneg %p2598_p7  ;;  %p2605_p11 = por %p2604_p10, %p2603_p3 }
  0x96   : > { %p2606_p12 = pnand %p2605_p11, %p2599_p9 }
  0x98   : > { %2609 = shalt.err (!%p2606_p12)
}
  0x99   : > { %s2610_s29 = scalar_lea.vmem %s3018_s17, 128  ;;  %s2779_s22 = smov [#allocation2]  }
  0x9a   : > { %p2611_p5 = scmp.ne.s32.totalorder %s3018_s17, %s2610_s29  ;;  %s2615_s11 = sshll.u32 %s2779_s22, 4  ;;  %s2616_s11 = int_to_ptr.vmem [resolvable:$false] %s2615_s11 }
  0x9b   : > { %s2617_s4 = scalar_lea.vmem %s2616_s11, 256  ;;  %p2618_p13 = scmp.lt.s32.totalorder %s3018_s17, %s2616_s11 }
  0x9c   : > { %p2613_p7 = pnand %p2611_p5, %p3033_p8  ;;  %p2619_p6 = scmp.lt.s32.totalorder %s2617_s4, %s2610_s29 }
  0x9e   : > { %p2614_p0 = pneg %p2613_p7  ;;  %p2620_p4 = por %p2619_p6, %p2618_p13 }
  0xa0   : > { %p2621_p1 = pnand %p2620_p4, %p2614_p0 }
  0xa2   : > { %2624 = shalt.err (!%p2621_p1)
}
  0xa3   : > { %2357 = dma.hbm_to_vmem [thread:$0]  (!%p3022_p2), %s3016_s10, 128, %s3018_s17, %s283_s2  }
  0xa4   : > { %s2111_s15 = sshll.u32 %s2771_s27, 8  ;;  %s3456_s1 = sld [smem:[#allocation23_spill]] }
  0xa5   : > { %s304_s29 = scalar_lea.vmem [#allocation5], %s2050_s18  ;;  %s3457_s4 = sand.u32 1, %s2771_s27  }
  0xa6   : > { %s311_s11 = sshll.u32 %s304_s29, 4  ;;  %s3068_s0 = scalar_lea.sflag [#allocation6], %s3457_s4  ;;  %s3064_s11 = int_to_ptr.vmem [resolvable:$true] %s311_s11 }
  0xaa   : > { %s3060_s22 = scalar_lea.hbm %s3456_s1, %s2111_s15  ;;  %s2630_s17 = scalar_lea.hbm %s3456_s1, 512 }
  0xab   : > { %s2625_s5 = scalar_lea.hbm %s3060_s22, 256  ;;  %p2631_p9 = scmp.lt.u32.totalorder %s3060_s22, %s3456_s1 }
  0xac   : > { %p2626_p6 = scmp.ne.s32.totalorder %s3060_s22, %s2625_s5  ;;  %p2632_p3 = scmp.lt.u32.totalorder %s2630_s17, %s2625_s5 }
  0xad   : > { %p2634_p11 = scmp.lt.u32.totalorder %s2625_s5, %s3060_s22 }
  0xae   : > { %p2628_p13 = pnand %p2626_p6, %p3033_p8  ;;  %p2633_p10 = por %p2632_p3, %p2631_p9 }
  0xb0   : > { %p2629_p0 = pneg %p2628_p13  ;;  %p2635_p12 = por %p2634_p11, %p2633_p10 }
  0xb2   : > { %p2636_p5 = pnand %p2635_p12, %p2629_p0 }
  0xb4   : > { %2639 = shalt.err (!%p2636_p5)
}
  0xb5   : > { %s2640_s18 = scalar_lea.vmem %s3064_s11, 256  ;;  %s2780_s16 = smov [#allocation5]  }
  0xb6   : > { %p2641_p7 = scmp.ne.s32.totalorder %s3064_s11, %s2640_s18  ;;  %s2645_s29 = sshll.u32 %s2780_s16, 4  ;;  %s2646_s29 = int_to_ptr.vmem [resolvable:$false] %s2645_s29 }
  0xb7   : > { %s2647_s4 = scalar_lea.vmem %s2646_s29, 512  ;;  %p2648_p6 = scmp.lt.s32.totalorder %s3064_s11, %s2646_s29 }
  0xb8   : > { %p2643_p4 = pnand %p2641_p7, %p3033_p8  ;;  %p2649_p13 = scmp.lt.s32.totalorder %s2647_s4, %s2640_s18 }
  0xba   : > { %p2644_p1 = pneg %p2643_p4  ;;  %p2650_p9 = por %p2649_p13, %p2648_p6 }
  0xbc   : > { %p2651_p3 = pnand %p2650_p9, %p2644_p1 }
  0xbe   : > { %2654 = shalt.err (!%p2651_p3)
}
  0xbf   : > { %s2781_s5 = smov 128   ;;  %s2782_s2 = smov 8  }
  0xc0   : > { %2360 = dma.hbm_to_vmem [thread:$0]  (!%p3022_p2), %s3060_s22, 256, %s3064_s11, %s3068_s0, %s2781_s5, %s2781_s5, %s2782_s2  }
  0xc1   : > { %s2053_s10 = sshll.u32 %s2771_s27, 4  ;;  %s324_s18 = scalar_lea.vmem [#allocation8], %s3001_s23 }
  0xc2   : > { %s3096_s12 = scalar_lea.hbm %s3427_s3, %s2053_s10  ;;  %s331_s16 = sshll.u32 %s324_s18, 4  ;;  %s332_s16 = int_to_ptr.vmem [resolvable:$true] %s331_s16 }
  0xc3   : > { %s3458_s29 = sand.u32 1, %s2771_s27   ;;  %s2655_s1 = scalar_lea.hbm %s3096_s12, 16 }
  0xc4   : > { %s322_s4 = scalar_lea.sflag [#allocation9], %s3458_s29  ;;  %p2656_p0 = scmp.ne.s32.totalorder %s3096_s12, %s2655_s1 }
  0xc5   : > { %s2660_s11 = scalar_lea.hbm %s3427_s3, 32  ;;  %p2661_p12 = scmp.lt.u32.totalorder %s3096_s12, %s3427_s3 }
  0xc6   : > { %p2658_p10 = pnand %p2656_p0, %p3033_p8  ;;  %p2662_p5 = scmp.lt.u32.totalorder %s2660_s11, %s2655_s1 }
  0xc7   : > { %p2664_p4 = scmp.lt.u32.totalorder %s2655_s1, %s3096_s12 }
  0xc8   : > { %p2659_p11 = pneg %p2658_p10  ;;  %p2663_p7 = por %p2662_p5, %p2661_p12 }
  0xca   : > { %p2665_p1 = por %p2664_p4, %p2663_p7 }
  0xcc   : > { %p2666_p6 = pnand %p2665_p1, %p2659_p11 }
  0xce   : > { %2669 = shalt.err (!%p2666_p6)
}
  0xcf   : > { %s2670_s23 = scalar_lea.vmem %s332_s16, 16  ;;  %s2783_s10 = smov [#allocation8]  }
  0xd0   : > { %p2671_p13 = scmp.ne.s32.totalorder %s332_s16, %s2670_s23  ;;  %s2675_s17 = sshll.u32 %s2783_s10, 4  ;;  %s2676_s17 = int_to_ptr.vmem [resolvable:$false] %s2675_s17 }
  0xd1   : > { %s2677_s15 = scalar_lea.vmem %s2676_s17, 32  ;;  %p2678_p0 = scmp.lt.s32.totalorder %s332_s16, %s2676_s17 }
  0xd2   : > { %p2673_p9 = pnand %p2671_p13, %p3033_p8  ;;  %p2679_p10 = scmp.lt.s32.totalorder %s2677_s15, %s2670_s23 }
  0xd4   : > { %p2674_p3 = pneg %p2673_p9  ;;  %p2680_p2 = por %p2679_p10, %p2678_p0 }
  0xd6   : > { %p2681_p5 = pnand %p2680_p2, %p2674_p3 }
  0xd8   : > { %2684 = shalt.err (!%p2681_p5)
}
  0xd9   : > { %p3459_p12 = scmp.ne.s32.totalorder %s3454_s19, 0  ;;  %p3460_p11 = scmp.ne.s32.totalorder %s3442_s8, 0 }
  0xda   : > { %s3121_s1 = sand.u32 (!%p3460_p11), 1, %s2763_s25   ;;  %p3461_p2 = scmp.ne.s32.totalorder (!%p3460_p11), %s3450_s21, 0 }
  0xdb   : > { %2363 = dma.hbm_to_vmem [thread:$0]  (!%p3459_p12), %s3096_s12, 16, %s332_s16, %s322_s4  }
  0xdc   : > { %340 = sbr.rel (%p3460_p11) target bundleno = 4576 (0x11e0), region = 48  ;;  %s2055_s14 = sshll.u32 (!%p3460_p11), %s3121_s1, 3 }
  0xdd   : > { %s343_s18 = scalar_lea.sflag (!%p3460_p11), [#allocation3], %s3121_s1  ;;  %s346_s29 = scalar_lea.vmem (!%p3460_p11), [#allocation2], %s2055_s14 }
  0xe3   : > { %2730 = dma.done.wait (%p3461_p2), %s343_s18, 128  }
  0xe4   : > { %2732 = vsyncadd (%p3461_p2), %s343_s18, 4294967168  ;;  %s351_s8 = sand.u32 1, %s2863_s30   ;;  %s2056_s19 = sshll.u32 %s3121_s1, 4 }
  0xe5   : > { %s352_s12 = scalar_lea.sflag [#allocation6], %s351_s8  ;;  %s3133_s16 = scalar_lea.vmem [#allocation5], %s2056_s19 }
  0xe6   : > { %2734 = dma.done.wait (%p3461_p2), %s352_s12, 256  }
  0xe7   : > { %2736 = vsyncadd (%p3461_p2), %s352_s12, 4294967040  ;;  %p3462_p8 = scmp.eq.s32.totalorder %s2863_s30, 0 }
  0xe9   : > { %2738 = dma.done.wait (%p3462_p8), [#allocation6], 128   ;;  %p3463_p7 = pmov %p3462_p8 }
  0xea   : > { %s365_s4 = scalar_lea.sflag [#allocation9], %s351_s8  ;;  %s367_s0 = scalar_lea.vmem [#allocation8], %s3121_s1 }
  0xeb   : > { %2740 = vsyncadd (%p3463_p7), [#allocation6], 4294967168 }
  0xec   : > { %2742 = dma.done.wait (%p3461_p2), %s365_s4, 16  }
  0xed   : > { %2744 = vsyncadd (%p3461_p2), %s365_s4, 4294967280  ;;  %p3464_p4 = pmov %p3463_p7 }
  0xef   : > { %2746 = dma.done.wait (%p3464_p4), [#allocation9], 128   ;;  %p3465_p1 = pmov %p3464_p4 }
  0xf1   : > { %2748 = vsyncadd (%p3465_p1), [#allocation9], 4294967168  ;;  %p3466_p6 = pmov %p3465_p1 }
  0xf2   : > { %p3467_p13 = pmov %p3465_p1 }
  0xf3   : > { %2750 = dma.done.wait (%p3466_p6), [#allocation12], 816  }
  0xf4   : > { %2752 = vsyncadd (%p3467_p13), [#allocation12], 4294966480  ;;  %vm431_vm0 = vcmask 261120   ;;  %v3156_v0 = vld [vmem:[%s346_s29] sm:$0xff]  ;;  %v2784_v8 = vmov 0.0   ;;  %vm2785_vm1 = vmmov 0  }
  0xf5   : > { %v432_v1 = vsel %vm431_vm0, %v3156_v0, 0.0  ;;  %v2435_v7 = vld [vmem:[#allocation11] ss:$12 sps:$4 sm:$0xff]   ;;  %2165 = vmatprep.subr.bf16.mxu0 %v2784_v8  ;;  %2169 = vmatprep.mubr.msk.bf16.mxu0 %vm2785_vm1, %v2784_v8  ;;  %v2436_v9 = vld [vmem:[#allocation11 + $0x18] ss:$12 sps:$4 sm:$0xff]   ;;  %s2786_s21 = smov 96  }
  0xf6   : > { %433 = vadd.xlane.f32.xlu0 %v432_v1  ;;  %2166 = vmatpush3.bf16.msra.mxu0 %v2435_v7  ;;  %v2062_v14 = vld [vmem:[#allocation10] ss:$0 sm:$0xff]  ;;  %v2063_v16 = vld [vmem:[#allocation10 + $0x1] ss:$0 sm:$0xff]  ;;  %v3173_v20 = vld [vmem:[#allocation13] ss:$0 sm:$0xff] }
  0xf7   : > { %2173 = vmatprep.subr.bf16.mxu1 %v2784_v8  ;;  %2167 = vmatprep.subr.bf16.mxu0 %v2784_v8  ;;  %s2787_s22 = smov 120   ;;  %s2788_s11 = smov 88   ;;  %vm529_vm2 = vcmask 64512   ;;  %v423_v40 = vld [vmem:[#allocation7] sm:$0xff]  ;;  %vm593_vm3 = vcmask 1043456   ;;  %vm981_vm4 = vcmask 130048  }
  0xf8   : > { %2175 = vmatprep.mubr.msk.bf16.mxu1 %vm2785_vm1, %v2784_v8  ;;  %s2789_s5 = smov 80   ;;  %s2790_s2 = smov 112   ;;  %vm983_vm5 = vcmask 195584  }
  0xf9   : > { %s2791_s23 = smov 72   ;;  %s2792_s10 = smov 104  }
  0xfa   : > { %2168 = vmatpush3.bf16.msra.mxu0 %v2436_v9  ;;  %s2793_s17 = smov 64   ;;  %s2794_s15 = smov 56  }
  0xfb   : > { %2179 = vmatprep.subr.bf16.mxu0 %v2784_v8  ;;  %s2795_s18 = smov 48   ;;  %s2796_s29 = smov 40  }
  0xfc   : > { %s2797_s8 = smov 32   ;;  %s2798_s19 = smov 8  }
  0xfd   : > { %s2799_s12 = smov 16   ;;  %s2800_s4 = smov 24  }
  0xfe   : > { %p3468_p3 = scmp.ne.s32.totalorder %s3451_s28, 0 }
 0x183   : > { %v434_v2 = vpop.xlane.xlu0 %433 }
 0x184   : > { %v436_v3 = vmul.f32 0.03125, %v434_v2 }
 0x186   : > { %v437_v4 = vsub.f32 %v3156_v0, %v436_v3 }
 0x188   : > { %v438_v5 = vmul.f32 %v437_v4, %v437_v4 }
 0x18a   : > { %v439_v6 = vsel %vm431_vm0, %v438_v5, 0.0 }
 0x18b   : > { %440 = vadd.xlane.f32.xlu0 %v439_v6 }
 0x218   : > { %v441_v10 = vpop.xlane.xlu0 %440 }
 0x219   : > { %v442_v11 = vmul.f32 0.03125, %v441_v10 }
 0x21b   : > { %v443_v12 = vadd.f32 1e-05, %v442_v11 }
 0x21d   : > { %2445 = vrsqrt.f32 %v443_v12 }
 0x227   : > { %v2446_v13 = vpop.eup %2445 }
 0x228   : > { %v445_v15 = vmul.f32 %v2446_v13, %v437_v4 }
 0x22a   : > { %v450_v17 = vmul.f32 %v2062_v14, %v445_v15 }
 0x22c   : > { %v455_v18 = vadd.f32 %v2063_v16, %v450_v17 }
 0x22e   : > { %v461_v19 = vpack.c.bf16 %v455_v18, %v455_v18 }
 0x230   : > { %2170 = vmatmul.mubr.msk.bf16.vlgmr.msra.gmra.mrb[0].mxu0 %vm431_vm0, %v461_v19 }
 0x231   : > { %2181 = vmatprep.mubr.msk.bf16.mxu0 %vm2785_vm1, %v2784_v8 }
 0x303   : > { %v517_v21 = vpop.f32.mrb[0].mxu0 }
 0x304   : > { %v518_v22 = vadd.f32 %v3173_v20, %v517_v21  ;;  %v2171_v23 = vpop.f32.mrb[1].mxu0 }
 0x305   : > { %v520_v24 = vpop.f32.mrb[2].mxu0 }
 0x306   : > { %v523_v25 = vmul.f32 0.35355338, %v518_v22  ;;  %v3176_v26 = vpack.c.bf16 %v518_v22, %v518_v22  ;;  %v2172_v27 = vpop.f32.mrb[3].mxu0 }
 0x308   : > { %v524_v28 = vpack.c.bf16 %v523_v25, %v523_v25  ;;  %527 = vrot.lane.b32.xlu1 %v3176_v26, %s2786_s21 }
 0x30a   : > { %638 = vrot.lane.b32.xlu0 %v524_v28, %s2787_s22 }
 0x30c   : > { %640 = vrot.lane.b32.xlu1 %v3176_v26, %s2788_s11 }
 0x310   : > { %750 = vrot.lane.b32.xlu1 %v3176_v26, %s2789_s5 }
 0x314   : > { %748 = vrot.lane.b32.xlu1 %v524_v28, %s2790_s2 }
 0x318   : > { %860 = vrot.lane.b32.xlu1 %v3176_v26, %s2791_s23 }
 0x31c   : > { %858 = vrot.lane.b32.xlu1 %v524_v28, %s2792_s10 }
 0x37a   : > { %v528_v29 = vpop.permute.xlu1 %527 }
 0x37b   : > { %v534_v30 = vsel %vm529_vm2, %v528_v29, 0 }
 0x37c   : > { %2174 = vmatpush3.bf16.xpose.msra.mxu1 %v534_v30  ;;  %v639_v34 = vpop.permute.xlu0 %638 }
 0x37d   : > { %2185 = vmatprep.subr.bf16.mxu1 %v2784_v8 }
 0x37e   : > { %v641_v31 = vpop.permute.xlu1 %640 }
 0x37f   : > { %v646_v32 = vsel %vm529_vm2, %v641_v31, 0 }
 0x382   : > { %v751_v33 = vpop.permute.xlu1 %750 }
 0x383   : > { %2176 = vmatmul.mubr.msk.bf16.vlgmr.msra.gmra.mrb[0].mxu1 %vm529_vm2, %v524_v28  ;;  %v756_v36 = vsel %vm529_vm2, %v751_v33, 0 }
 0x384   : > { %2186 = vmatpush3.bf16.xpose.msra.mxu1 %v646_v32  ;;  %2187 = vmatprep.mubr.msk.bf16.mxu1 %vm2785_vm1, %v2784_v8 }
 0x385   : > { %2197 = vmatprep.subr.bf16.mxu1 %v2784_v8 }
 0x386   : > { %v749_v35 = vpop.permute.xlu1 %748 }
 0x38a   : > { %v861_v37 = vpop.permute.xlu1 %860 }
 0x38b   : > { %2188 = vmatmul.mubr.msk.bf16.vlgmr.msra.gmra.mrb[4].mxu1 %vm529_vm2, %v639_v34  ;;  %v866_v38 = vsel %vm529_vm2, %v861_v37, 0 }
 0x38c   : > { %2198 = vmatpush3.bf16.xpose.msra.mxu1 %v756_v36  ;;  %2199 = vmatprep.mubr.msk.bf16.mxu1 %vm2785_vm1, %v2784_v8 }
 0x38d   : > { %2209 = vmatprep.subr.bf16.mxu1 %v2784_v8 }
 0x38e   : > { %v859_v39 = vpop.permute.xlu1 %858 }
 0x393   : > { %2200 = vmatmul.mubr.msk.bf16.vlgmr.msra.gmra.mrb[8].mxu1 %vm529_vm2, %v749_v35 }
 0x394   : > { %2210 = vmatpush3.bf16.xpose.msra.mxu1 %v866_v38  ;;  %2211 = vmatprep.mubr.msk.bf16.mxu1 %vm2785_vm1, %v2784_v8 }
 0x395   : > { %2221 = vmatprep.subr.bf16.mxu1 %v2784_v8 }
 0x39b   : > { %2212 = vmatmul.mubr.msk.bf16.vlgmr.msra.gmra.mrb[12].mxu1 %vm529_vm2, %v859_v39 }
 0x39c   : > { %2225 = vmatprep.mubr.msk.bf16.mxu1 %vm2785_vm1, %v2784_v8 }
 0x456   : > { %v570_v41 = vpop.f32.mrb[0].mxu1 }
 0x457   : > { %v571_v42 = vadd.f32 %v570_v41, %v423_v40  ;;  %v2177_v43 = vpop.f32.mrb[1].mxu1 }
 0x458   : > { %v573_v44 = vpop.f32.mrb[2].mxu1 }
 0x459   : > { %v2178_v45 = vpop.f32.mrb[3].mxu1  ;;  %v576_v46 = vsel %vm529_vm2, %v571_v42, -inf }
 0x45a   : > { %577 = vmax.xlane.f32.xlu1 %v576_v46 }
 0x45e   : > { %v682_v47 = vpop.f32.mrb[4].mxu1 }
 0x45f   : > { %v683_v48 = vadd.f32 %v682_v47, %v423_v40  ;;  %v2189_v49 = vpop.f32.mrb[5].mxu1 }
 0x460   : > { %v685_v50 = vpop.f32.mrb[6].mxu1 }
 0x461   : > { %v2190_v51 = vpop.f32.mrb[7].mxu1  ;;  %v688_v52 = vsel %vm529_vm2, %v683_v48, -inf }
 0x462   : > { %689 = vmax.xlane.f32.xlu0 %v688_v52 }
 0x466   : > { %v792_v53 = vpop.f32.mrb[8].mxu1 }
 0x467   : > { %v793_v54 = vadd.f32 %v792_v53, %v423_v40  ;;  %v2201_v55 = vpop.f32.mrb[9].mxu1 }
 0x468   : > { %v795_v56 = vpop.f32.mrb[10].mxu1 }
 0x469   : > { %v2202_v57 = vpop.f32.mrb[11].mxu1  ;;  %v798_v58 = vsel %vm529_vm2, %v793_v54, -inf }
 0x46a   : > { %799 = vmax.xlane.f32.xlu1 %v798_v58 }
 0x46e   : > { %v902_v59 = vpop.f32.mrb[12].mxu1 }
 0x46f   : > { %v903_v60 = vadd.f32 %v902_v59, %v423_v40  ;;  %v2213_v61 = vpop.f32.mrb[13].mxu1 }
 0x470   : > { %v905_v62 = vpop.f32.mrb[14].mxu1 }
 0x471   : > { %v2214_v63 = vpop.f32.mrb[15].mxu1  ;;  %v908_v1 = vsel %vm529_vm2, %v903_v60, -inf }
 0x472   : > { %909 = vmax.xlane.f32.xlu0 %v908_v1 }
 0x4e7   : > { %v578_v2 = vpop.xlane.xlu1 %577 }
 0x4e8   : > { %v579_v3 = vsub.f32 %v571_v42, %v578_v2 }
 0x4ea   : > { %v580_v4 = vmul.f32 1.442695, %v579_v3 }
 0x4ec   : > { %2447 = vpow2.f32 %v580_v4 }
 0x4ef   : > { %v690_v5 = vpop.xlane.xlu0 %689 }
 0x4f0   : > { %v691_v6 = vsub.f32 %v683_v48, %v690_v5  ;;  %v2437_v48 = vld [vmem:[#allocation11] ss:$12 sps:$4 sm:$0xff]  }
 0x4f2   : > { %v692_v7 = vmul.f32 1.442695, %v691_v6 }
 0x4f4   : > { %2449 = vpow2.f32 %v692_v7 }
 0x4f6   : > { %v2448_v9 = vpop.eup %2447 }
 0x4f7   : > { %v582_v10 = vsel %vm529_vm2, %v2448_v9, 0.0  ;;  %v800_v18 = vpop.xlane.xlu1 %799 }
 0x4f8   : > { %583 = vadd.xlane.f32.xlu1 %v582_v10  ;;  %v801_v19 = vsub.f32 %v793_v54, %v800_v18 }
 0x4fa   : > { %v802_v21 = vmul.f32 1.442695, %v801_v19 }
 0x4fe   : > { %v2450_v11 = vpop.eup %2449 }
 0x4ff   : > { %v910_v12 = vpop.xlane.xlu0 %909  ;;  %v694_v13 = vsel %vm529_vm2, %v2450_v11, 0.0 }
 0x500   : > { %v911_v14 = vsub.f32 %v903_v60, %v910_v12  ;;  %695 = vadd.xlane.f32.xlu0 %v694_v13  ;;  %v2438_v60 = vld [vmem:[#allocation11 + $0x18] ss:$12 sps:$4 sm:$0xff]  }
 0x502   : > { %v912_v15 = vmul.f32 1.442695, %v911_v14 }
 0x504   : > { %2451 = vpow2.f32 %v912_v15 }
 0x505   : > { %2453 = vpow2.f32 %v802_v21  ;;  %v2439_v21 = vld [vmem:[#allocation11 + $0x4] ss:$12 sps:$4 sm:$0xff]  }
 0x509   : > { %588 = vrot.lane.b32.xlu1 %v3176_v26, %s2793_s17 }
 0x50e   : > { %v2452_v16 = vpop.eup %2451 }
 0x50f   : > { %v914_v17 = vsel %vm529_vm2, %v2452_v16, 0.0  ;;  %v2454_v22 = vpop.eup %2453 }
 0x510   : > { %915 = vadd.xlane.f32.xlu0 %v914_v17  ;;  %v804_v23 = vsel %vm529_vm2, %v2454_v22, 0.0 }
 0x526   : > { %700 = vrot.lane.b32.xlu0 %v3176_v26, %s2794_s15 }
 0x52a   : > { %1006 = vrot.lane.b32.xlu0 %v2437_v48, %s2797_s8 }
 0x52d   : > { %805 = vadd.xlane.f32.xlu1 %v804_v23 }
 0x53e   : > { %810 = vrot.lane.b32.xlu1 %v3176_v26, %s2795_s18 }
 0x542   : > { %920 = vrot.lane.b32.xlu1 %v3176_v26, %s2796_s29 }
 0x585   : > { %v584_v24 = vpop.xlane.xlu1 %583 }
 0x586   : > { %2455 = vrcp.f32 %v584_v24 }
 0x589   : > { %v589_v25 = vpop.permute.xlu1 %588 }
 0x58a   : > { %v595_v27 = vsel %vm593_vm3, %v589_v25, 0 }
 0x58b   : > { %2180 = vmatpush3.bf16.msra.mxu0 %v595_v27 }
 0x58c   : > { %2191 = vmatprep.subr.bf16.mxu0 %v2784_v8 }
 0x58d   : > { %v696_v29 = vpop.xlane.xlu0 %695 }
 0x58e   : > { %2457 = vrcp.f32 %v696_v29  ;;  %v3268_v29 = vld [vmem:[#allocation13 + $0x1] ss:$0 sm:$0xff] }
 0x590   : > { %v2456_v28 = vpop.eup %2455 }
 0x591   : > { %v586_v30 = vmul.f32 %v2456_v28, %v2448_v9 }
 0x593   : > { %v587_v31 = vpack.c.bf16 %v586_v30, %v586_v30 }
 0x595   : > { %2182 = vmatmul.mubr.msk.bf16.vlgmr.msra.gmra.mrb[4].mxu0 %vm529_vm2, %v587_v31 }
 0x596   : > { %2193 = vmatprep.mubr.msk.bf16.mxu0 %vm2785_vm1, %v2784_v8 }
 0x598   : > { %v2458_v26 = vpop.eup %2457 }
 0x599   : > { %v698_v33 = vmul.f32 %v2458_v26, %v2450_v11  ;;  %v421_v26 = vld [vmem:[%s3133_s16] sm:$0xff] }
 0x59b   : > { %v699_v36 = vpack.c.bf16 %v698_v33, %v698_v33 }
 0x59d   : > { %v916_v32 = vpop.xlane.xlu0 %915 }
 0x5a1   : > { %v701_v34 = vpop.permute.xlu0 %700 }
 0x5a2   : > { %v706_v35 = vsel %vm593_vm3, %v701_v34, 0 }
 0x5a3   : > { %2192 = vmatpush3.bf16.msra.mxu0 %v706_v35 }
 0x5a4   : > { %2203 = vmatprep.subr.bf16.mxu0 %v2784_v8 }
 0x5a5   : > { %v1007_v53 = vpop.permute.xlu0 %1006 }
 0x5a6   : > { %2194 = vmatmul.mubr.msk.bf16.vlgmr.msra.gmra.mrb[8].mxu0 %vm529_vm2, %v699_v36  ;;  %2222 = vmatpush3.bf16.msra.mxu1 %v1007_v53 }
 0x5a7   : > { %2205 = vmatprep.mubr.msk.bf16.mxu0 %vm2785_vm1, %v2784_v8  ;;  %2223 = vmatprep.subr.bf16.mxu1 %v2784_v8 }
 0x5ba   : > { %v806_v37 = vpop.xlane.xlu1 %805 }
 0x5bb   : > { %2459 = vrcp.f32 %v806_v37  ;;  %v2080_v37 = vld [vmem:[#allocation10 + $0x2] ss:$0 sm:$0xff] }
 0x5bc   : > { %2461 = vrcp.f32 %v916_v32  ;;  %v422_v32 = vld [vmem:[%s3133_s16 + $0x8] sm:$0xff]  ;;  %s2108_s16 = sshll.u32 %s2863_s30, 7  ;;  %s1878_s30 = scalar_lea.sflag [#allocation4], %s3121_s1 }
 0x5bd   : > { %v1149_v35 = vpack.c.bf16 %v422_v32, %v421_v26 }
 0x5be   : > { %v811_v38 = vpop.permute.xlu1 %810 }
 0x5bf   : > { %v816_v39 = vsel %vm593_vm3, %v811_v38, 0 }
 0x5c0   : > { %2204 = vmatpush3.bf16.msra.mxu0 %v816_v39  ;;  %v2081_v39 = vld [vmem:[#allocation10 + $0x3] ss:$0 sm:$0xff] }
 0x5c1   : > { %2215 = vmatprep.subr.bf16.mxu0 %v2784_v8 }
 0x5c2   : > { %v921_v42 = vpop.permute.xlu1 %920 }
 0x5c3   : > { %v926_v45 = vsel %vm593_vm3, %v921_v42, 0 }
 0x5c5   : > { %v2460_v40 = vpop.eup %2459 }
 0x5c6   : > { %v808_v41 = vmul.f32 %v2460_v40, %v2454_v22  ;;  %v2462_v44 = vpop.eup %2461  ;;  %v2440_v22 = vld [vmem:[#allocation11 + $0x1c] ss:$12 sps:$4 sm:$0xff]  }
 0x5c7   : > { %v918_v46 = vmul.f32 %v2462_v44, %v2452_v16 }
 0x5c8   : > { %v809_v43 = vpack.c.bf16 %v808_v41, %v808_v41 }
 0x5c9   : > { %v919_v47 = vpack.c.bf16 %v918_v46, %v918_v46 }
 0x5ca   : > { %2206 = vmatmul.mubr.msk.bf16.vlgmr.msra.gmra.mrb[12].mxu0 %vm529_vm2, %v809_v43 }
 0x5cb   : > { %2216 = vmatpush3.bf16.msra.mxu0 %v926_v45  ;;  %2217 = vmatprep.mubr.msk.bf16.mxu0 %vm2785_vm1, %v2784_v8 }
 0x5cc   : > { %2229 = vmatprep.subr.bf16.mxu0 %v2784_v8 }
 0x5d2   : > { %2218 = vmatmul.mubr.msk.bf16.vlgmr.msra.gmra.mrb[16].mxu0 %vm529_vm2, %v919_v47 }
 0x5d3   : > { %2233 = vmatprep.mubr.msk.bf16.mxu0 %vm2785_vm1, %v2784_v8  ;;  %2230 = vmatpush3.bf16.msra.mxu0 %v2439_v21 }
 0x5d4   : > { %2231 = vmatprep.subr.bf16.mxu0 %v2784_v8 }
 0x5d7   : > { %2232 = vmatpush3.bf16.msra.mxu0 %v2440_v22 }
 0x5d8   : > { %2245 = vmatprep.subr.bf16.mxu0 %v2784_v8 }
 0x668   : > { %v631_v49 = vpop.f32.mrb[4].mxu0 }
 0x669   : > { %v2183_v50 = vpop.f32.mrb[5].mxu0 }
 0x66a   : > { %v634_v51 = vpop.f32.mrb[6].mxu0 }
 0x66b   : > { %v2184_v52 = vpop.f32.mrb[7].mxu0 }
 0x679   : > { %v742_v54 = vpop.f32.mrb[8].mxu0 }
 0x67a   : > { %969 = vrot.lane.b32.xlu1 %v742_v54, %s2798_s19  ;;  %v2195_v55 = vpop.f32.mrb[9].mxu0 }
 0x67b   : > { %v745_v56 = vpop.f32.mrb[10].mxu0 }
 0x67c   : > { %v2196_v57 = vpop.f32.mrb[11].mxu0 }
 0x69d   : > { %v852_v58 = vpop.f32.mrb[12].mxu0 }
 0x69e   : > { %973 = vrot.lane.b32.xlu0 %v852_v58, %s2799_s12  ;;  %v2207_v59 = vpop.f32.mrb[13].mxu0 }
 0x69f   : > { %v855_v61 = vpop.f32.mrb[14].mxu0 }
 0x6a0   : > { %v2208_v62 = vpop.f32.mrb[15].mxu0 }
 0x6a2   : > { %1008 = vrot.lane.b32.xlu0 %v2438_v60, %s2797_s8 }
 0x6a5   : > { %v962_v63 = vpop.f32.mrb[16].mxu0 }
 0x6a6   : > { %977 = vrot.lane.b32.xlu1 %v962_v63, %s2800_s4  ;;  %v2219_v1 = vpop.f32.mrb[17].mxu0 }
 0x6a7   : > { %v965_v2 = vpop.f32.mrb[18].mxu0 }
 0x6a8   : > { %v2220_v3 = vpop.f32.mrb[19].mxu0 }
 0x6aa   : > { %1012 = vrot.lane.b32.xlu1 %v3173_v20, %s2797_s8 }
 0x6ec   : > { %v970_v5 = vpop.permute.xlu1 %969 }
 0x6ed   : > { %v980_v7 = vsel %vm529_vm2, %v631_v49, %v970_v5  ;;  %v2087_v5 = vld [vmem:[%s367_s0] ss:$0 sm:$0xff]  ;;  %s418_s0 = scalar_lea.vmem [#allocation14], %s2055_s14 }
 0x710   : > { %v974_v4 = vpop.permute.xlu0 %973 }
 0x711   : > { %v982_v9 = vsel %vm981_vm4, %v980_v7, %v974_v4 }
 0x714   : > { %v1009_v6 = vpop.permute.xlu0 %1008 }
 0x715   : > { %2224 = vmatpush3.bf16.msra.mxu1 %v1009_v6 }
 0x716   : > { %2237 = vmatprep.subr.bf16.mxu1 %v2784_v8 }
 0x718   : > { %v978_v10 = vpop.permute.xlu1 %977 }
 0x719   : > { %v984_v11 = vsel %vm983_vm5, %v982_v9, %v978_v10 }
 0x71a   : > { %v990_v12 = vpack.c.bf16 %v984_v11, %v984_v11 }
 0x71c   : > { %2226 = vmatmul.mubr.msk.bf16.vlgmr.msra.gmra.mrb[16].mxu1 %vm431_vm0, %v990_v12  ;;  %v1013_v20 = vpop.permute.xlu1 %1012 }
 0x71d   : > { %2241 = vmatprep.mubr.msk.bf16.mxu1 %vm2785_vm1, %v2784_v8 }
 0x7ef   : > { %v1052_v13 = vpop.f32.mrb[16].mxu1 }
 0x7f0   : > { %v1053_v14 = vadd.f32 %v1052_v13, %v1013_v20  ;;  %v2227_v15 = vpop.f32.mrb[17].mxu1 }
 0x7f1   : > { %v1055_v16 = vpop.f32.mrb[18].mxu1 }
 0x7f2   : > { %v3257_v17 = vadd.f32 %v1053_v14, %v3156_v0  ;;  %v2228_v18 = vpop.f32.mrb[19].mxu1 }
 0x7f4   : > { %v1059_v19 = vsel %vm431_vm0, %v3257_v17, 0.0 }
 0x7f5   : > { %1060 = vadd.xlane.f32.xlu0 %v1059_v19 }
 0x80b   : > { %1150 = vrot.lane.b32.xlu0 %v2439_v21, %s2786_s21 }
 0x80f   : > { %1156 = vrot.lane.b32.xlu0 %v3268_v29, %s2786_s21 }
 0x882   : > { %v1061_v23 = vpop.xlane.xlu0 %1060 }
 0x883   : > { %v1062_v0 = vmul.f32 0.03125, %v1061_v23 }
 0x885   : > { %v1063_v24 = vsub.f32 %v3257_v17, %v1062_v0 }
 0x886   : > { %v1151_v28 = vpop.permute.xlu0 %1150 }
 0x887   : > { %v1064_v25 = vmul.f32 %v1063_v24, %v1063_v24  ;;  %2238 = vmatpush3.bf16.msra.mxu1 %v1151_v28 }
 0x888   : > { %2239 = vmatprep.subr.bf16.mxu1 %v2784_v8 }
 0x889   : > { %v1065_v27 = vsel %vm431_vm0, %v1064_v25, 0.0 }
 0x88a   : > { %1066 = vadd.xlane.f32.xlu1 %v1065_v27  ;;  %v1157_v43 = vpop.permute.xlu0 %1156 }
 0x89b   : > { %1152 = vrot.lane.b32.xlu1 %v2440_v22, %s2786_s21 }
 0x917   : > { %v1067_v30 = vpop.xlane.xlu1 %1066 }
 0x918   : > { %v1068_v31 = vmul.f32 0.03125, %v1067_v30 }
 0x91a   : > { %v1069_v33 = vadd.f32 1e-05, %v1068_v31 }
 0x91b   : > { %v1153_v34 = vpop.permute.xlu1 %1152 }
 0x91c   : > { %2463 = vrsqrt.f32 %v1069_v33  ;;  %2240 = vmatpush3.bf16.msra.mxu1 %v1153_v34 }
 0x91d   : > { %2251 = vmatprep.subr.bf16.mxu1 %v2784_v8 }
 0x91f   : > { %2242 = vmatmul.mubr.msk.bf16.vlgmr.msra.gmra.mrb[20].mxu1 %vm431_vm0, %v1149_v35 }
 0x920   : > { %2253 = vmatprep.mubr.msk.bf16.mxu1 %vm2785_vm1, %v2784_v8 }
 0x926   : > { %v2464_v36 = vpop.eup %2463 }
 0x927   : > { %v1071_v38 = vmul.f32 %v2464_v36, %v1063_v24 }
 0x929   : > { %v1076_v40 = vmul.f32 %v2080_v37, %v1071_v38 }
 0x92b   : > { %v1081_v41 = vadd.f32 %v2081_v39, %v1076_v40 }
 0x92d   : > { %v1087_v42 = vpack.c.bf16 %v1081_v41, %v1081_v41 }
 0x92f   : > { %2234 = vmatmul.mubr.msk.bf16.vlgmr.msra.gmra.mrb[20].mxu0 %vm431_vm0, %v1087_v42 }
 0x930   : > { %2247 = vmatprep.mubr.msk.bf16.mxu0 %vm2785_vm1, %v2784_v8 }
 0x9f2   : > { %v1196_v44 = vpop.f32.mrb[20].mxu1 }
 0x9f3   : > { %v2243_v45 = vpop.f32.mrb[21].mxu1  ;;  %v1197_v46 = vadd.f32 %v1196_v44, %v1157_v43 }
 0x9f4   : > { %v1199_v47 = vpop.f32.mrb[22].mxu1 }
 0x9f5   : > { %v1200_v48 = vadd.f32 %v1199_v47, %v1157_v43  ;;  %v2244_v49 = vpop.f32.mrb[23].mxu1 }
 0x9f7   : > { %v3281_v50 = vpack.c.bf16 %v1200_v48, %v1197_v46 }
 0x9f9   : > { %1320 = vrot.lane.b32.xlu1 %v3281_v50, %s2787_s22  ;;  %v1216_v51 = vsel %vm529_vm2, %v3281_v50, 0 }
 0x9fa   : > { %2246 = vmatpush3.bf16.xpose.msra.mxu0 %v1216_v51 }
 0x9fb   : > { %2257 = vmatprep.subr.bf16.mxu0 %v2784_v8 }
 0x9fd   : > { %1428 = vrot.lane.b32.xlu1 %v3281_v50, %s2790_s2 }
 0xa01   : > { %1536 = vrot.lane.b32.xlu1 %v3281_v50, %s2792_s10 }
 0xa02   : > { %v1143_v52 = vpop.f32.mrb[20].mxu0 }
 0xa03   : > { %v1144_v53 = vadd.f32 %v3268_v29, %v1143_v52  ;;  %v2235_v54 = vpop.f32.mrb[21].mxu0 }
 0xa04   : > { %v1146_v55 = vpop.f32.mrb[22].mxu0 }
 0xa05   : > { %v1203_v56 = vmul.f32 0.35355338, %v1144_v53  ;;  %v2236_v57 = vpop.f32.mrb[23].mxu0 }
 0xa07   : > { %v1204_v58 = vpack.c.bf16 %v1203_v56, %v1203_v56 }
 0xa09   : > { %1318 = vrot.lane.b32.xlu0 %v1204_v58, %s2787_s22  ;;  %2248 = vmatmul.mubr.msk.bf16.vlgmr.msra.gmra.mrb[24].mxu0 %vm529_vm2, %v1204_v58 }
 0xa0a   : > { %2259 = vmatprep.mubr.msk.bf16.mxu0 %vm2785_vm1, %v2784_v8 }
 0xa0d   : > { %1426 = vrot.lane.b32.xlu0 %v1204_v58, %s2790_s2  ;;  %s2801_s2 = smov [#allocation14]  }
 0xa11   : > { %1534 = vrot.lane.b32.xlu0 %v1204_v58, %s2792_s10 }
 0xa6b   : > { %v1321_v59 = vpop.permute.xlu1 %1320 }
 0xa6c   : > { %v1326_v60 = vsel %vm529_vm2, %v1321_v59, 0 }
 0xa6d   : > { %2258 = vmatpush3.bf16.xpose.msra.mxu0 %v1326_v60 }
 0xa6e   : > { %2269 = vmatprep.subr.bf16.mxu0 %v2784_v8 }
 0xa6f   : > { %v1429_v61 = vpop.permute.xlu1 %1428 }
 0xa70   : > { %v1434_v63 = vsel %vm529_vm2, %v1429_v61, 0 }
 0xa73   : > { %v1537_v1 = vpop.permute.xlu1 %1536 }
 0xa74   : > { %v1542_v3 = vsel %vm529_vm2, %v1537_v1, 0 }
 0xa7b   : > { %v1319_v62 = vpop.permute.xlu0 %1318 }
 0xa7c   : > { %2260 = vmatmul.mubr.msk.bf16.vlgmr.msra.gmra.mrb[28].mxu0 %vm529_vm2, %v1319_v62 }
 0xa7d   : > { %2270 = vmatpush3.bf16.xpose.msra.mxu0 %v1434_v63  ;;  %2271 = vmatprep.mubr.msk.bf16.mxu0 %vm2785_vm1, %v2784_v8 }
 0xa7e   : > { %2281 = vmatprep.subr.bf16.mxu0 %v2784_v8 }
 0xa7f   : > { %v1427_v2 = vpop.permute.xlu0 %1426 }
 0xa83   : > { %v1535_v4 = vpop.permute.xlu0 %1534 }
 0xa84   : > { %2272 = vmatmul.mubr.msk.bf16.vlgmr.msra.gmra.mrb[32].mxu0 %vm529_vm2, %v1427_v2 }
 0xa85   : > { %2282 = vmatpush3.bf16.xpose.msra.mxu0 %v1542_v3  ;;  %2283 = vmatprep.mubr.msk.bf16.mxu0 %vm2785_vm1, %v2784_v8 }
 0xa86   : > { %2293 = vmatprep.subr.bf16.mxu0 %v2784_v8 }
 0xa8c   : > { %2284 = vmatmul.mubr.msk.bf16.vlgmr.msra.gmra.mrb[36].mxu0 %vm529_vm2, %v1535_v4 }
 0xa8d   : > { %2297 = vmatprep.mubr.msk.bf16.mxu0 %vm2785_vm1, %v2784_v8 }
 0xadc   : > { %v1252_v6 = vpop.f32.mrb[24].mxu0 }
 0xadd   : > { %v1253_v7 = vadd.f32 %v2087_v5, %v1252_v6  ;;  %v2249_v9 = vpop.f32.mrb[25].mxu0 }
 0xade   : > { %v1255_v10 = vpop.f32.mrb[26].mxu0 }
 0xadf   : > { %v2250_v11 = vpop.f32.mrb[27].mxu0  ;;  %v1258_v12 = vsel %vm981_vm4, %v1253_v7, -inf  ;;  %v2441_v10 = vld [vmem:[#allocation11 + $0x4] ss:$12 sps:$4 sm:$0xff]  }
 0xae0   : > { %1259 = vmax.xlane.f32.xlu1 %v1258_v12 }
 0xb4f   : > { %v1362_v20 = vpop.f32.mrb[28].mxu0 }
 0xb50   : > { %v1363_v13 = vadd.f32 %v2087_v5, %v1362_v20  ;;  %v2261_v14 = vpop.f32.mrb[29].mxu0 }
 0xb51   : > { %v1365_v15 = vpop.f32.mrb[30].mxu0 }
 0xb52   : > { %v2262_v16 = vpop.f32.mrb[31].mxu0  ;;  %v1368_v18 = vsel %vm981_vm4, %v1363_v13, -inf }
 0xb53   : > { %1369 = vmax.xlane.f32.xlu0 %v1368_v18 }
 0xb57   : > { %v1470_v19 = vpop.f32.mrb[32].mxu0 }
 0xb58   : > { %v1471_v21 = vadd.f32 %v2087_v5, %v1470_v19  ;;  %v2273_v22 = vpop.f32.mrb[33].mxu0 }
 0xb59   : > { %v1473_v23 = vpop.f32.mrb[34].mxu0 }
 0xb5a   : > { %v2274_v0 = vpop.f32.mrb[35].mxu0  ;;  %v1476_v24 = vsel %vm981_vm4, %v1471_v21, -inf  ;;  %v2442_v23 = vld [vmem:[#allocation11 + $0x1c] ss:$12 sps:$4 sm:$0xff]  }
 0xb5b   : > { %1477 = vmax.xlane.f32.xlu0 %v1476_v24 }
 0xb5f   : > { %v1578_v25 = vpop.f32.mrb[36].mxu0 }
 0xb60   : > { %v1579_v27 = vadd.f32 %v2087_v5, %v1578_v25  ;;  %v2285_v28 = vpop.f32.mrb[37].mxu0 }
 0xb61   : > { %v1581_v30 = vpop.f32.mrb[38].mxu0 }
 0xb62   : > { %v2286_v31 = vpop.f32.mrb[39].mxu0  ;;  %v1584_v26 = vsel %vm981_vm4, %v1579_v27, -inf }
 0xb63   : > { %1585 = vmax.xlane.f32.xlu1 %v1584_v26 }
 0xb6d   : > { %v1260_v32 = vpop.xlane.xlu1 %1259 }
 0xb6e   : > { %v1261_v33 = vsub.f32 %v1253_v7, %v1260_v32 }
 0xb70   : > { %v1262_v34 = vmul.f32 1.442695, %v1261_v33 }
 0xb72   : > { %2465 = vpow2.f32 %v1262_v34 }
 0xb7c   : > { %v2466_v35 = vpop.eup %2465 }
 0xb7d   : > { %v1264_v36 = vsel %vm981_vm4, %v2466_v35, 0.0 }
 0xb7e   : > { %1265 = vadd.xlane.f32.xlu0 %v1264_v36 }
 0xbe0   : > { %v1370_v37 = vpop.xlane.xlu0 %1369 }
 0xbe1   : > { %v1371_v38 = vsub.f32 %v1363_v13, %v1370_v37 }
 0xbe3   : > { %v1372_v39 = vmul.f32 1.442695, %v1371_v38 }
 0xbe5   : > { %2467 = vpow2.f32 %v1372_v39 }
 0xbe8   : > { %v1478_v40 = vpop.xlane.xlu0 %1477 }
 0xbe9   : > { %v1479_v41 = vsub.f32 %v1471_v21, %v1478_v40 }
 0xbeb   : > { %v1480_v42 = vmul.f32 1.442695, %v1479_v41 }
 0xbed   : > { %2469 = vpow2.f32 %v1480_v42 }
 0xbef   : > { %v2468_v43 = vpop.eup %2467 }
 0xbf0   : > { %v1374_v44 = vsel %vm981_vm4, %v2468_v43, 0.0  ;;  %v1586_v47 = vpop.xlane.xlu1 %1585 }
 0xbf1   : > { %1375 = vadd.xlane.f32.xlu1 %v1374_v44  ;;  %v1587_v48 = vsub.f32 %v1579_v27, %v1586_v47 }
 0xbf3   : > { %v1588_v49 = vmul.f32 1.442695, %v1587_v48 }
 0xbf5   : > { %2471 = vpow2.f32 %v1588_v49 }
 0xbf7   : > { %v2470_v45 = vpop.eup %2469 }
 0xbf8   : > { %v1482_v46 = vsel %vm981_vm4, %v2470_v45, 0.0 }
 0xbf9   : > { %1483 = vadd.xlane.f32.xlu0 %v1482_v46 }
 0xbff   : > { %v2472_v51 = vpop.eup %2471 }
 0xc00   : > { %v1590_v52 = vsel %vm981_vm4, %v2472_v51, 0.0 }
 0xc02   : > { %1380 = vrot.lane.b32.xlu1 %v3281_v50, %s2788_s11 }
 0xc0b   : > { %v1266_v53 = vpop.xlane.xlu0 %1265 }
 0xc0c   : > { %2473 = vrcp.f32 %v1266_v53 }
 0xc0f   : > { %1271 = vrot.lane.b32.xlu0 %v3281_v50, %s2786_s21 }
 0xc13   : > { %1596 = vrot.lane.b32.xlu0 %v3281_v50, %s2791_s23  ;;  %s2689_s23 = sshll.u32 %s2801_s2, 4  ;;  %s2690_s23 = int_to_ptr.vmem [resolvable:$false] %s2689_s23 }
 0xc14   : > { %s2691_s10 = scalar_lea.vmem %s2690_s23, 256 }
 0xc16   : > { %v2474_v55 = vpop.eup %2473 }
 0xc17   : > { %v1268_v57 = vmul.f32 %v2474_v55, %v2466_v35 }
 0xc19   : > { %v1269_v59 = vpack.c.bf16 %v1268_v57, %v1268_v57 }
 0xc26   : > { %1591 = vadd.xlane.f32.xlu1 %v1590_v52  ;;  %v2444_v52 = vld [vmem:[#allocation11 + $0x20] ss:$12 sps:$4 sm:$0xff]  }
 0xc37   : > { %1488 = vrot.lane.b32.xlu1 %v3281_v50, %s2789_s5  ;;  %s3379_s5 = scalar_lea.hbm %s3431_s7, %s2108_s16 }
 0xc3b   : > { %1678 = vrot.lane.b32.xlu1 %v2441_v10, %s2797_s8 }
 0xc7e   : > { %v1376_v54 = vpop.xlane.xlu1 %1375 }
 0xc7f   : > { %2475 = vrcp.f32 %v1376_v54 }
 0xc82   : > { %v1381_v61 = vpop.permute.xlu1 %1380 }
 0xc86   : > { %v1484_v56 = vpop.xlane.xlu0 %1483 }
 0xc87   : > { %2477 = vrcp.f32 %v1484_v56 }
 0xc89   : > { %v2476_v60 = vpop.eup %2475 }
 0xc8a   : > { %v1272_v58 = vpop.permute.xlu0 %1271  ;;  %v1378_v50 = vmul.f32 %v2476_v60, %v2468_v43  ;;  %v2101_v60 = vld [vmem:[#allocation10 + $0x5] ss:$0 sm:$0xff] }
 0xc8b   : > { %2252 = vmatpush3.bf16.msra.mxu1 %v1272_v58  ;;  %v2100_v58 = vld [vmem:[#allocation10 + $0x4] ss:$0 sm:$0xff] }
 0xc8c   : > { %2263 = vmatprep.subr.bf16.mxu1 %v2784_v8  ;;  %v1379_v62 = vpack.c.bf16 %v1378_v50, %v1378_v50 }
 0xc8e   : > { %2254 = vmatmul.mubr.msk.bf16.vlgmr.msra.gmra.mrb[24].mxu1 %vm981_vm4, %v1269_v59  ;;  %v1597_v5 = vpop.permute.xlu0 %1596 }
 0xc8f   : > { %2264 = vmatpush3.bf16.msra.mxu1 %v1381_v61  ;;  %2265 = vmatprep.mubr.msk.bf16.mxu1 %vm2785_vm1, %v2784_v8 }
 0xc90   : > { %2275 = vmatprep.subr.bf16.mxu1 %v2784_v8 }
 0xc91   : > { %v2478_v63 = vpop.eup %2477 }
 0xc92   : > { %v1486_v2 = vmul.f32 %v2478_v63, %v2470_v45 }
 0xc94   : > { %v1487_v4 = vpack.c.bf16 %v1486_v2, %v1486_v2 }
 0xc96   : > { %2266 = vmatmul.mubr.msk.bf16.vlgmr.msra.gmra.mrb[28].mxu1 %vm981_vm4, %v1379_v62 }
 0xc97   : > { %2277 = vmatprep.mubr.msk.bf16.mxu1 %vm2785_vm1, %v2784_v8 }
 0xcb3   : > { %v1592_v1 = vpop.xlane.xlu1 %1591 }
 0xcb4   : > { %2479 = vrcp.f32 %v1592_v1 }
 0xcb7   : > { %v1489_v3 = vpop.permute.xlu1 %1488 }
 0xcb8   : > { %2276 = vmatpush3.bf16.msra.mxu1 %v1489_v3 }
 0xcb9   : > { %2287 = vmatprep.subr.bf16.mxu1 %v2784_v8 }
 0xcbb   : > { %2278 = vmatmul.mubr.msk.bf16.vlgmr.msra.gmra.mrb[32].mxu1 %vm981_vm4, %v1487_v4  ;;  %v1679_v11 = vpop.permute.xlu1 %1678 }
 0xcbc   : > { %2288 = vmatpush3.bf16.msra.mxu1 %v1597_v5  ;;  %2289 = vmatprep.mubr.msk.bf16.mxu1 %vm2785_vm1, %v2784_v8 }
 0xcbd   : > { %2301 = vmatprep.subr.bf16.mxu1 %v2784_v8  ;;  %2294 = vmatpush3.bf16.msra.mxu0 %v1679_v11 }
 0xcbe   : > { %v2480_v6 = vpop.eup %2479  ;;  %2295 = vmatprep.subr.bf16.mxu0 %v2784_v8 }
 0xcbf   : > { %v1594_v7 = vmul.f32 %v2480_v6, %v2472_v51  ;;  %v2443_v51 = vld [vmem:[#allocation11 + $0x8] ss:$12 sps:$4 sm:$0xff]  }
 0xcc1   : > { %v1595_v9 = vpack.c.bf16 %v1594_v7, %v1594_v7 }
 0xcc3   : > { %2290 = vmatmul.mubr.msk.bf16.vlgmr.msra.gmra.mrb[36].mxu1 %vm981_vm4, %v1595_v9 }
 0xcc4   : > { %2305 = vmatprep.mubr.msk.bf16.mxu1 %vm2785_vm1, %v2784_v8  ;;  %2302 = vmatpush3.bf16.msra.mxu1 %v2443_v51 }
 0xcc5   : > { %2303 = vmatprep.subr.bf16.mxu1 %v2784_v8 }
 0xcc8   : > { %2304 = vmatpush3.bf16.msra.mxu1 %v2444_v52 }
 0xd61   : > { %v1311_v12 = vpop.f32.mrb[24].mxu1 }
 0xd62   : > { %v2255_v20 = vpop.f32.mrb[25].mxu1 }
 0xd63   : > { %v1314_v13 = vpop.f32.mrb[26].mxu1 }
 0xd64   : > { %v2256_v14 = vpop.f32.mrb[27].mxu1 }
 0xd69   : > { %v1420_v15 = vpop.f32.mrb[28].mxu1 }
 0xd6a   : > { %1643 = vrot.lane.b32.xlu0 %v1420_v15, %s2798_s19  ;;  %v2267_v16 = vpop.f32.mrb[29].mxu1 }
 0xd6b   : > { %v1423_v18 = vpop.f32.mrb[30].mxu1 }
 0xd6c   : > { %v2268_v19 = vpop.f32.mrb[31].mxu1 }
 0xd8e   : > { %v1528_v21 = vpop.f32.mrb[32].mxu1 }
 0xd8f   : > { %1647 = vrot.lane.b32.xlu1 %v1528_v21, %s2799_s12  ;;  %v2279_v22 = vpop.f32.mrb[33].mxu1 }
 0xd90   : > { %v1531_v0 = vpop.f32.mrb[34].mxu1 }
 0xd91   : > { %v2280_v24 = vpop.f32.mrb[35].mxu1 }
 0xd93   : > { %1680 = vrot.lane.b32.xlu1 %v2442_v23, %s2797_s8 }
 0xd96   : > { %v1636_v25 = vpop.f32.mrb[36].mxu1 }
 0xd97   : > { %1651 = vrot.lane.b32.xlu0 %v1636_v25, %s2800_s4  ;;  %v2291_v27 = vpop.f32.mrb[37].mxu1 }
 0xd98   : > { %v1639_v28 = vpop.f32.mrb[38].mxu1 }
 0xd99   : > { %v2292_v30 = vpop.f32.mrb[39].mxu1 }
 0xd9b   : > { %1684 = vrot.lane.b32.xlu0 %v3268_v29, %s2797_s8 }
 0xddc   : > { %v1644_v26 = vpop.permute.xlu0 %1643 }
 0xddd   : > { %v1654_v33 = vsel %vm529_vm2, %v1311_v12, %v1644_v26 }
 0xe01   : > { %v1648_v31 = vpop.permute.xlu1 %1647 }
 0xe02   : > { %v1655_v34 = vsel %vm981_vm4, %v1654_v33, %v1648_v31 }
 0xe05   : > { %v1681_v32 = vpop.permute.xlu1 %1680 }
 0xe06   : > { %2296 = vmatpush3.bf16.msra.mxu0 %v1681_v32 }
 0xe07   : > { %2309 = vmatprep.subr.bf16.mxu0 %v2784_v8 }
 0xe09   : > { %v1652_v35 = vpop.permute.xlu0 %1651 }
 0xe0a   : > { %v1656_v36 = vsel %vm983_vm5, %v1655_v34, %v1652_v35 }
 0xe0b   : > { %v1662_v37 = vpack.c.bf16 %v1656_v36, %v1656_v36 }
 0xe0d   : > { %2298 = vmatmul.mubr.msk.bf16.vlgmr.msra.gmra.mrb[40].mxu0 %vm431_vm0, %v1662_v37  ;;  %v1685_v29 = vpop.permute.xlu0 %1684 }
 0xe0e   : > { %2313 = vmatprep.mubr.msk.bf16.mxu0 %vm2785_vm1, %v2784_v8 }
 0xee0   : > { %v1724_v38 = vpop.f32.mrb[40].mxu0 }
 0xee1   : > { %v1725_v39 = vadd.f32 %v1724_v38, %v1685_v29  ;;  %v2299_v40 = vpop.f32.mrb[41].mxu0 }
 0xee2   : > { %v1727_v41 = vpop.f32.mrb[42].mxu0 }
 0xee3   : > { %v1730_v42 = vadd.f32 %v1725_v39, %v3257_v17  ;;  %v2300_v43 = vpop.f32.mrb[43].mxu0  ;;  %v2102_v17 = vld [vmem:[#allocation13 + $0x2] ss:$0 sm:$0xff] }
 0xee5   : > { %v1731_v44 = vsel %vm431_vm0, %v1730_v42, 0.0 }
 0xee6   : > { %1732 = vadd.xlane.f32.xlu1 %v1731_v44 }
 0xef7   : > { %1825 = vrot.lane.b32.xlu1 %v2444_v52, %s2786_s21 }
 0xefb   : > { %1829 = vrot.lane.b32.xlu1 %v2102_v17, %s2786_s21 }
 0xf73   : > { %v1733_v45 = vpop.xlane.xlu1 %1732 }
 0xf74   : > { %v1734_v46 = vmul.f32 0.03125, %v1733_v45 }
 0xf76   : > { %v1735_v47 = vsub.f32 %v1730_v42, %v1734_v46 }
 0xf77   : > { %v1826_v63 = vpop.permute.xlu1 %1825 }
 0xf78   : > { %v1736_v48 = vmul.f32 %v1735_v47, %v1735_v47 }
 0xf7a   : > { %v1737_v49 = vsel %vm431_vm0, %v1736_v48, 0.0 }
 0xf7b   : > { %1738 = vadd.xlane.f32.xlu0 %v1737_v49  ;;  %v1830_v7 = vpop.permute.xlu1 %1829 }
 0xf91   : > { %1823 = vrot.lane.b32.xlu0 %v2443_v51, %s2786_s21  ;;  %s1891_s21 = sshll.u32 %s418_s0, 4  ;;  %s3381_s21 = int_to_ptr.vmem [resolvable:$true] %s1891_s21 }
 0xf92   : > { %s2685_s14 = scalar_lea.vmem %s3381_s21, 128  ;;  %p2692_p5 = scmp.lt.s32.totalorder %s3381_s21, %s2690_s23 }
 0xf93   : > { %p2686_p9 = scmp.ne.s32.totalorder %s3381_s21, %s2685_s14  ;;  %p2693_p12 = scmp.lt.s32.totalorder %s2691_s10, %s2685_s14 }
 0xf95   : > { %p2687_p0 = pnand %p2686_p9, %p3468_p3  ;;  %p2694_p11 = por %p2693_p12, %p2692_p5 }
 0xf97   : > { %p2688_p10 = pneg %p2687_p0 }
 0xf99   : > { %p2695_p2 = pnand %p2694_p11, %p2688_p10 }
0x1008   : > { %v1739_v53 = vpop.xlane.xlu0 %1738 }
0x1009   : > { %v1740_v54 = vmul.f32 0.03125, %v1739_v53 }
0x100b   : > { %v1741_v55 = vadd.f32 1e-05, %v1740_v54 }
0x100c   : > { %v1824_v56 = vpop.permute.xlu0 %1823 }
0x100d   : > { %2481 = vrsqrt.f32 %v1741_v55  ;;  %2310 = vmatpush3.bf16.msra.mxu0 %v1824_v56 }
0x100e   : > { %2311 = vmatprep.subr.bf16.mxu0 %v2784_v8 }
0x1011   : > { %2312 = vmatpush3.bf16.msra.mxu0 %v1826_v63 }
0x1017   : > { %v2482_v57 = vpop.eup %2481 }
0x1018   : > { %v1743_v59 = vmul.f32 %v2482_v57, %v1735_v47 }
0x101a   : > { %v1748_v61 = vmul.f32 %v2100_v58, %v1743_v59 }
0x101c   : > { %v1753_v50 = vadd.f32 %v2101_v60, %v1748_v61 }
0x101e   : > { %v1759_v62 = vpack.c.bf16 %v1753_v50, %v1753_v50 }
0x1020   : > { %2306 = vmatmul.mubr.msk.bf16.vlgmr.msra.gmra.mrb[40].mxu1 %vm431_vm0, %v1759_v62 }
0x10f3   : > { %v1815_v1 = vpop.f32.mrb[40].mxu1 }
0x10f4   : > { %v1816_v2 = vadd.f32 %v2102_v17, %v1815_v1  ;;  %v2307_v3 = vpop.f32.mrb[41].mxu1 }
0x10f5   : > { %v1818_v4 = vpop.f32.mrb[42].mxu1 }
0x10f6   : > { %v1821_v5 = vmax.f32 %v1816_v2, 0.0  ;;  %v2308_v6 = vpop.f32.mrb[43].mxu1 }
0x10f8   : > { %v1822_v8 = vpack.c.bf16 %v1821_v5, %v1821_v5 }
0x10fa   : > { %2314 = vmatmul.mubr.msk.bf16.vlgmr.msra.gmra.mrb[44].mxu0 %vm431_vm0, %v1822_v8 }
0x11cd   : > { %v1869_v9 = vpop.f32.mrb[44].mxu0 }
0x11ce   : > { %v1870_v10 = vadd.f32 %v1869_v9, %v1830_v7  ;;  %v2315_v11 = vpop.f32.mrb[45].mxu0 }
0x11cf   : > { %v1872_v12 = vpop.f32.mrb[46].mxu0 }
0x11d0   : > { %v1875_v20 = vadd.f32 %v1870_v10, %v1730_v42  ;;  %v2316_v13 = vpop.f32.mrb[47].mxu0 }
0x11d2   : > { %1876 = vst.msk [vmem:[%s418_s0] sm:$0xff] %vm431_vm0, %v1875_v20 }
0x11d3   : > { %2698 = shalt.err (!%p2695_p2)
}
0x11d4   : > { %s2699_s1 = scalar_lea.hbm %s3379_s5, 128  ;;  %s2703_s18 = scalar_lea.hbm %s3431_s7, 256 }
0x11d5   : > { %p2700_p8 = scmp.ne.s32.totalorder %s3379_s5, %s2699_s1  ;;  %p2704_p1 = scmp.lt.u32.totalorder %s3379_s5, %s3431_s7 }
0x11d6   : > { %p2705_p6 = scmp.lt.u32.totalorder %s2703_s18, %s2699_s1  ;;  %p2707_p9 = scmp.lt.u32.totalorder %s2699_s1, %s3379_s5 }
0x11d7   : > { %p2701_p7 = pnand %p2700_p8, %p3468_p3 }
0x11d8   : > { %p2706_p13 = por %p2705_p6, %p2704_p1 }
0x11d9   : > { %p2702_p4 = pneg %p2701_p7 }
0x11da   : > { %p2708_p0 = por %p2707_p9, %p2706_p13 }
0x11dc   : > { %p2709_p10 = pnand %p2708_p0, %p2702_p4 }
0x11de   : > { %2712 = shalt.err (!%p2709_p10)
}
0x11df   : > { %2339 = dma.vmem_to_hbm [thread:$0]  (%p3468_p3), %s3381_s21, 128, %s3379_s5, %s1878_s30  }
0x11e0 PF: > { %s1903_s19 = sand.u32 1, %s2759_s24   ;;  %p3469_p5 = scmp.ne.s32.totalorder %s3452_s9, 0 }
0x11e1   : > { %p3470_p12 = scmp.ge.s32.totalorder %s2771_s27, 2  ;;  %s1904_s12 = scalar_lea.sflag [#allocation4], %s1903_s19 }
0x11e3   : > { %p2365_p11 = pnand %p3470_p12, %p3469_p5 }
0x11e5   : > { %2754 = dma.done.wait (!%p2365_p11), %s1904_s12, 128  }
0x11e6   : > { %2756 = vsyncadd (!%p2365_p11), %s1904_s12, 4294967168  ;;  %p27_p2 = scmp.ge.s32.totalorder %s2975_s13, 4   ;;  %s3471_s24 = smov %s2763_s25 }
0x11e7   : > { %s3472_s25 = smov %s2767_s26  ;;  %s3473_s26 = smov %s2986_s20 }
0x11e8   : > { %s3474_s27 = smov %s2975_s13  ;;  %29 = sbr.rel (!%p27_p2) target bundleno = 16 (0x10), region = 135 }
0x11ef   :  { %1909 = vsyncpa [#allocation3], 1 }
0x11f0   :  { %1911 = vsyncpa [#allocation3 + $0x1], 1 }
0x11f1   :  { %1912 = vsyncpa [#allocation6], 1 }
0x11f2   :  { %1914 = vsyncpa [#allocation6 + $0x1], 1 }
0x11f3   :  { %1915 = vsyncpa [#allocation9], 1 }
0x11f4   :  { %1917 = vsyncpa [#allocation9 + $0x1], 1 }
0x11f5   :  { %1918 = vsyncpa [#allocation12], 1 }
0x11f6   :  { %1919 = vsyncpa [#allocation4], 1 }
0x11f7   :  { %1921 = vsyncpa [#allocation4 + $0x1], 1 }

</bundles_post_ra>
